<compile_context>
chip_gen: v5e
topology: v5e:2x2
jax: 0.10.0
libtpu: 0.0.40
codegen_flags: <defaults>
</compile_context>

<pallas_src>
import math

import jax
import jax.numpy as jnp
from jax.experimental import pallas as pl
from jax.experimental.pallas import tpu as pltpu

# ---- scaled-down bart-base encoder config (architecture preserved) ----------
VOCAB = 96          # bart-base: 50265
MAX_POS = 64        # bart-base: 1024 (+2 offset rows)
POS_OFFSET = 2      # BartLearnedPositionalEmbedding offset
D_MODEL = 128       # bart-base: 768   (128 chosen so blocks are lane-dense)
N_HEADS = 4         # bart-base: 12
HEAD_DIM = D_MODEL // N_HEADS
FFN = 512           # bart-base: 3072  (keeps the 4x ratio, lane-dense)
N_LAYERS = 2        # bart-base: 6
EPS = 1e-5


def _layernorm(x, g, b):
    # x: (S, D), g/b: (1, D); biased variance, matching torch LayerNorm.
    mean = jnp.mean(x, axis=-1, keepdims=True)
    var = jnp.mean((x - mean) ** 2, axis=-1, keepdims=True)
    return (x - mean) * jax.lax.rsqrt(var + EPS) * g + b


def _gelu_tanh(x):
    # TODO(synk): BART uses exact erf-based GELU; tanh approximation keeps the
    # transcendental on the Mosaic/EUP-supported tanh path.
    return 0.5 * x * (1.0 + jnp.tanh(0.7978845608028654
                                     * (x + 0.044715 * x * x * x)))


# -----------------------------------------------------------------------------
# Fused encoder kernel: embedding LayerNorm + N_LAYERS post-LN encoder layers.
# -----------------------------------------------------------------------------
def encoder_kernel(x_ref, lne_g_ref, lne_b_ref,
                   wqkv_ref, bqkv_ref, wo_ref, bo_ref,
                   ln1g_ref, ln1b_ref,
                   w1_ref, b1_ref, w2_ref, b2_ref,
                   ln2g_ref, ln2b_ref,
                   o_ref):
    S = x_ref.shape[1]
    scaling = 1.0 / math.sqrt(HEAD_DIM)

    # layernorm_embedding, fused into the same kernel.
    h = _layernorm(x_ref[0], lne_g_ref[...], lne_b_ref[...])        # (S, D)

    for l in range(N_LAYERS):                 # static, unrolled layer loop
        # ---- self-attention (post-LN, no mask, eval-mode dropout) ----------
        # Fused QKV: one batched matmul over 3*N_HEADS per-head weight slabs
        # stored as (Dh, D) ("rhs transposed", lane-dense).
        xb = jnp.broadcast_to(h[None, :, :], (3 * N_HEADS, S, D_MODEL))
        qkv = jnp.einsum("hsd,hed->hse", xb, wqkv_ref[l],
                         preferred_element_type=jnp.float32) + bqkv_ref[l]
        q = qkv[:N_HEADS] * scaling                                  # (H, S, Dh)
        k = qkv[N_HEADS:2 * N_HEADS]
        v = qkv[2 * N_HEADS:]

        scores = jnp.einsum("hqe,hke->hqk", q, k,
                            preferred_element_type=jnp.float32)     # (H, S, S)
        scores = scores - jnp.max(scores, axis=-1, keepdims=True)
        p = jnp.exp(scores)
        p = p * pl.reciprocal(jnp.sum(p, axis=-1, keepdims=True), approx=True)
        ctx = jnp.einsum("hqk,hke->hqe", p, v,
                         preferred_element_type=jnp.float32)        # (H, S, Dh)

        # concat(heads) @ Wo  ==  sum_h ctx[h] @ Wo[h]  (no lane concat)
        attn = jnp.einsum("hse,hed->hsd", ctx, wo_ref[l],
                          preferred_element_type=jnp.float32).sum(axis=0)
        attn = attn + bo_ref[l]
        h = _layernorm(h + attn, ln1g_ref[l], ln1b_ref[l])

        # ---- feed-forward ---------------------------------------------------
        f = jnp.dot(h, w1_ref[l], preferred_element_type=jnp.float32) + b1_ref[l]
        f = _gelu_tanh(f)
        f = jnp.dot(f, w2_ref[l], preferred_element_type=jnp.float32) + b2_ref[l]
        h = _layernorm(h + f, ln2g_ref[l], ln2b_ref[l])

    o_ref[0] = h


# -----------------------------------------------------------------------------
# pallas_call wrapper
# -----------------------------------------------------------------------------
def _full_spec(shape):
    n = len(shape)
    return pl.BlockSpec(shape, lambda i, _n=n: (0,) * _n)


def encoder_forward(params, input_ids):
    B, S = input_ids.shape
    # Glue (plain JAX): embedding gathers (token + learned positional, offset 2).
    tok = params["tok_emb"][input_ids]                               # (B, S, D)
    pos = params["pos_emb"][jnp.arange(S) + POS_OFFSET]              # (S, D)
    x = (tok + pos[None, :, :]).astype(jnp.float32)

    args = (x,
            params["ln_emb_g"], params["ln_emb_b"],
            params["wqkv"], params["bqkv"], params["wo"], params["bo"],
            params["ln1_g"], params["ln1_b"],
            params["w1"], params["b1"], params["w2"], params["b2"],
            params["ln2_g"], params["ln2_b"])

    in_specs = [pl.BlockSpec((1, S, D_MODEL), lambda i: (i, 0, 0))]
    in_specs += [_full_spec(a.shape) for a in args[1:]]

    return pl.pallas_call(
        encoder_kernel,
        out_shape=jax.ShapeDtypeStruct((B, S, D_MODEL), jnp.float32),
        grid=(B,),
        in_specs=in_specs,
        out_specs=pl.BlockSpec((1, S, D_MODEL), lambda i: (i, 0, 0)),
        compiler_params=pltpu.CompilerParams(
            dimension_semantics=("parallel",)),
    )(*args)


# -----------------------------------------------------------------------------
# Parameters (deterministic synthetic init; no checkpoint load)
# -----------------------------------------------------------------------------
def init_params(key):
    def dense(k, fan_in, fan_out):
        return 0.02 * jax.random.normal(k, (fan_in, fan_out), jnp.float32)

    keys = iter(jax.random.split(key, 2 + 6 * N_LAYERS))
    tok_emb = 0.02 * jax.random.normal(next(keys), (VOCAB, D_MODEL), jnp.float32)
    tok_emb = tok_emb.at[1].set(0.0)          # padding_idx = 1 (zero init)
    pos_emb = 0.02 * jax.random.normal(
        next(keys), (MAX_POS + POS_OFFSET, D_MODEL), jnp.float32)

    def to_heads_t(w):
        # (D_in, D_out) -> (H, Dh, D_in): per-head slab in lane-dense
        # "rhs transposed" form (last dim = D_MODEL = 128).
        return w.T.reshape(N_HEADS, HEAD_DIM, D_MODEL)

    wqkv, bqkv, wo, bo = [], [], [], []
    ln1_g, ln1_b, w1, b1 = [], [], [], []
    w2, b2, ln2_g, ln2_b = [], [], [], []
    for _ in range(N_LAYERS):
        wq = dense(next(keys), D_MODEL, D_MODEL)
        wk = dense(next(keys), D_MODEL, D_MODEL)
        wv = dense(next(keys), D_MODEL, D_MODEL)
        wo_l = dense(next(keys), D_MODEL, D_MODEL)
        wqkv.append(jnp.concatenate(
            [to_heads_t(wq), to_heads_t(wk), to_heads_t(wv)], axis=0))  # (3H,Dh,D)
        bqkv.append(jnp.zeros((3 * N_HEADS, 1, HEAD_DIM), jnp.float32))
        wo.append(wo_l.reshape(N_HEADS, HEAD_DIM, D_MODEL))             # (H,Dh,D)
        bo.append(jnp.zeros((1, D_MODEL), jnp.float32))
        ln1_g.append(jnp.ones((1, D_MODEL), jnp.float32))
        ln1_b.append(jnp.zeros((1, D_MODEL), jnp.float32))
        w1.append(dense(next(keys), D_MODEL, FFN))
        b1.append(jnp.zeros((1, FFN), jnp.float32))
        w2.append(dense(next(keys), FFN, D_MODEL))
        b2.append(jnp.zeros((1, D_MODEL), jnp.float32))
        ln2_g.append(jnp.ones((1, D_MODEL), jnp.float32))
        ln2_b.append(jnp.zeros((1, D_MODEL), jnp.float32))

    return {
        "tok_emb": tok_emb,
        "pos_emb": pos_emb,
        "ln_emb_g": jnp.ones((1, D_MODEL), jnp.float32),
        "ln_emb_b": jnp.zeros((1, D_MODEL), jnp.float32),
        "wqkv": jnp.stack(wqkv), "bqkv": jnp.stack(bqkv),
        "wo": jnp.stack(wo), "bo": jnp.stack(bo),
        "ln1_g": jnp.stack(ln1_g), "ln1_b": jnp.stack(ln1_b),
        "w1": jnp.stack(w1), "b1": jnp.stack(b1),
        "w2": jnp.stack(w2), "b2": jnp.stack(b2),
        "ln2_g": jnp.stack(ln2_g), "ln2_b": jnp.stack(ln2_b),
    }


# -----------------------------------------------------------------------------
# Forward pass: RandomEncoder.forward(input_ids) -> last_hidden_state
# -----------------------------------------------------------------------------
if __name__ == "__main__":
    key = jax.random.PRNGKey(0)
    params = init_params(key)

    B, S = 2, 8
    input_ids = jax.random.randint(jax.random.fold_in(key, 999),
                                   (B, S), 0, VOCAB, dtype=jnp.int32)

    fwd = jax.jit(encoder_forward)
    out = jax.block_until_ready(fwd(params, input_ids))
    assert out.shape == (B, S, D_MODEL)
    assert out.dtype == jnp.float32
    assert bool(jnp.all(jnp.isfinite(out)))
    print("KERNEL_OK")
</pallas_src>

<mosaic_0001>
module attributes {stable_mosaic.version = 11 : i64} {
  func.func @encoder_kernel(%arg0: i32, %arg1: memref<1x8x128xf32, #tpu.memory_space<vmem>>, %arg2: memref<1x128xf32, #tpu.memory_space<vmem>>, %arg3: memref<1x128xf32, #tpu.memory_space<vmem>>, %arg4: memref<2x12x32x128xf32, #tpu.memory_space<vmem>>, %arg5: memref<2x12x1x32xf32, #tpu.memory_space<vmem>>, %arg6: memref<2x4x32x128xf32, #tpu.memory_space<vmem>>, %arg7: memref<2x1x128xf32, #tpu.memory_space<vmem>>, %arg8: memref<2x1x128xf32, #tpu.memory_space<vmem>>, %arg9: memref<2x1x128xf32, #tpu.memory_space<vmem>>, %arg10: memref<2x128x512xf32, #tpu.memory_space<vmem>>, %arg11: memref<2x1x512xf32, #tpu.memory_space<vmem>>, %arg12: memref<2x512x128xf32, #tpu.memory_space<vmem>>, %arg13: memref<2x1x128xf32, #tpu.memory_space<vmem>>, %arg14: memref<2x1x128xf32, #tpu.memory_space<vmem>>, %arg15: memref<2x1x128xf32, #tpu.memory_space<vmem>>, %arg16: memref<1x8x128xf32, #tpu.memory_space<vmem>>) attributes {dimension_semantics = [#tpu.dimension_semantics<parallel>], iteration_bounds = array<i64: 2>, scalar_prefetch = 0 : i64, scratch_operands = 0 : i64, tpu.core_type = #tpu.core_type<tc>, window_params = [{transform_indices = @transform_0, window_bounds = array<i64: 1, 8, 128>}, {pipeline_mode = #tpu.pipeline_mode<synchronous>, transform_indices = @transform_1, window_bounds = array<i64: 1, 128>}, {pipeline_mode = #tpu.pipeline_mode<synchronous>, transform_indices = @transform_2, window_bounds = array<i64: 1, 128>}, {pipeline_mode = #tpu.pipeline_mode<synchronous>, transform_indices = @transform_3, window_bounds = array<i64: 2, 12, 32, 128>}, {pipeline_mode = #tpu.pipeline_mode<synchronous>, transform_indices = @transform_4, window_bounds = array<i64: 2, 12, 1, 32>}, {pipeline_mode = #tpu.pipeline_mode<synchronous>, transform_indices = @transform_5, window_bounds = array<i64: 2, 4, 32, 128>}, {pipeline_mode = #tpu.pipeline_mode<synchronous>, transform_indices = @transform_6, window_bounds = array<i64: 2, 1, 128>}, {pipeline_mode = #tpu.pipeline_mode<synchronous>, transform_indices = @transform_7, window_bounds = array<i64: 2, 1, 128>}, {pipeline_mode = #tpu.pipeline_mode<synchronous>, transform_indices = @transform_8, window_bounds = array<i64: 2, 1, 128>}, {pipeline_mode = #tpu.pipeline_mode<synchronous>, transform_indices = @transform_9, window_bounds = array<i64: 2, 128, 512>}, {pipeline_mode = #tpu.pipeline_mode<synchronous>, transform_indices = @transform_10, window_bounds = array<i64: 2, 1, 512>}, {pipeline_mode = #tpu.pipeline_mode<synchronous>, transform_indices = @transform_11, window_bounds = array<i64: 2, 512, 128>}, {pipeline_mode = #tpu.pipeline_mode<synchronous>, transform_indices = @transform_12, window_bounds = array<i64: 2, 1, 128>}, {pipeline_mode = #tpu.pipeline_mode<synchronous>, transform_indices = @transform_13, window_bounds = array<i64: 2, 1, 128>}, {pipeline_mode = #tpu.pipeline_mode<synchronous>, transform_indices = @transform_14, window_bounds = array<i64: 2, 1, 128>}, {transform_indices = @transform_15, window_bounds = array<i64: 1, 8, 128>}]} {
    %c0 = arith.constant 0 : index
    %c0_0 = arith.constant 0 : index
    %c0_1 = arith.constant 0 : index
    %0 = vector.load %arg1[%c0, %c0_0, %c0_1] : memref<1x8x128xf32, #tpu.memory_space<vmem>>, vector<1x8x128xf32>
    %1 = vector.shape_cast %0 : vector<1x8x128xf32> to vector<8x128xf32>
    %c0_2 = arith.constant 0 : index
    %c0_3 = arith.constant 0 : index
    %2 = vector.load %arg2[%c0_2, %c0_3] : memref<1x128xf32, #tpu.memory_space<vmem>>, vector<1x128xf32>
    %c0_4 = arith.constant 0 : index
    %c0_5 = arith.constant 0 : index
    %3 = vector.load %arg3[%c0_4, %c0_5] : memref<1x128xf32, #tpu.memory_space<vmem>>, vector<1x128xf32>
    %cst = arith.constant dense<0.000000e+00> : vector<8xf32>
    %4 = vector.multi_reduction <add>, %1, %cst [1] : vector<8x128xf32> to vector<8xf32>
    %5 = vector.shape_cast %4 : vector<8xf32> to vector<8x1xf32>
    %cst_6 = arith.constant 1.280000e+02 : f32
    %6 = vector.broadcast %cst_6 : f32 to vector<8x1xf32>
    %7 = arith.divf %5, %6 : vector<8x1xf32>
    %8 = vector.broadcast %7 : vector<8x1xf32> to vector<8x128xf32>
    %9 = arith.subf %1, %8 : vector<8x128xf32>
    %10 = arith.mulf %9, %9 : vector<8x128xf32>
    %cst_7 = arith.constant dense<0.000000e+00> : vector<8xf32>
    %11 = vector.multi_reduction <add>, %10, %cst_7 [1] : vector<8x128xf32> to vector<8xf32>
    %12 = vector.shape_cast %11 : vector<8xf32> to vector<8x1xf32>
    %cst_8 = arith.constant 1.280000e+02 : f32
    %13 = vector.broadcast %cst_8 : f32 to vector<8x1xf32>
    %14 = arith.divf %12, %13 : vector<8x1xf32>
    %15 = vector.broadcast %7 : vector<8x1xf32> to vector<8x128xf32>
    %16 = arith.subf %1, %15 : vector<8x128xf32>
    %cst_9 = arith.constant 9.99999974E-6 : f32
    %17 = vector.broadcast %cst_9 : f32 to vector<8x1xf32>
    %18 = arith.addf %14, %17 : vector<8x1xf32>
    %19 = math.rsqrt %18 : vector<8x1xf32>
    %20 = vector.broadcast %19 : vector<8x1xf32> to vector<8x128xf32>
    %21 = arith.mulf %16, %20 : vector<8x128xf32>
    %22 = vector.broadcast %2 : vector<1x128xf32> to vector<8x128xf32>
    %23 = arith.mulf %21, %22 : vector<8x128xf32>
    %24 = vector.broadcast %3 : vector<1x128xf32> to vector<8x128xf32>
    %25 = arith.addf %23, %24 : vector<8x128xf32>
    %26 = vector.shape_cast %25 : vector<8x128xf32> to vector<1x8x128xf32>
    %27 = vector.shape_cast %26 : vector<1x8x128xf32> to vector<1x8x128xf32>
    %28 = vector.broadcast %27 : vector<1x8x128xf32> to vector<12x8x128xf32>
    %c0_10 = arith.constant 0 : index
    %c0_11 = arith.constant 0 : index
    %c0_12 = arith.constant 0 : index
    %c0_13 = arith.constant 0 : index
    %29 = vector.load %arg4[%c0_10, %c0_11, %c0_12, %c0_13] : memref<2x12x32x128xf32, #tpu.memory_space<vmem>>, vector<1x12x32x128xf32>
    %30 = vector.shape_cast %29 : vector<1x12x32x128xf32> to vector<12x32x128xf32>
    "tpu.trace_start"() <{level = 10 : i32, message = "hsd,hed->hse"}> : () -> ()
    %cst_14 = arith.constant dense<0.000000e+00> : vector<12x8x32xf32>
    %31 = tpu.matmul %28, %30, %cst_14 {dimension_numbers = #tpu.dot_dimension_numbers<[2], [2], [1], [1], [0, 0, 0, 1, 1, 1], [0], [0]>} : vector<12x8x128xf32>, vector<12x32x128xf32>, vector<12x8x32xf32> -> vector<12x8x32xf32>
    "tpu.trace_stop"() : () -> ()
    %c0_15 = arith.constant 0 : index
    %c0_16 = arith.constant 0 : index
    %c0_17 = arith.constant 0 : index
    %c0_18 = arith.constant 0 : index
    %32 = vector.load %arg5[%c0_15, %c0_16, %c0_17, %c0_18] : memref<2x12x1x32xf32, #tpu.memory_space<vmem>>, vector<1x12x1x32xf32>
    %33 = vector.shape_cast %32 : vector<1x12x1x32xf32> to vector<12x1x32xf32>
    %34 = vector.broadcast %33 : vector<12x1x32xf32> to vector<12x8x32xf32>
    %35 = arith.addf %31, %34 : vector<12x8x32xf32>
    %36 = vector.extract_strided_slice %35 {offsets = [0, 0, 0], sizes = [4, 8, 32], strides = [1, 1, 1]} : vector<12x8x32xf32> to vector<4x8x32xf32>
    %cst_19 = arith.constant 0.176776692 : f32
    %37 = vector.broadcast %cst_19 : f32 to vector<4x8x32xf32>
    %38 = arith.mulf %36, %37 : vector<4x8x32xf32>
    %39 = vector.extract_strided_slice %35 {offsets = [4, 0, 0], sizes = [4, 8, 32], strides = [1, 1, 1]} : vector<12x8x32xf32> to vector<4x8x32xf32>
    %40 = vector.extract_strided_slice %35 {offsets = [8, 0, 0], sizes = [4, 8, 32], strides = [1, 1, 1]} : vector<12x8x32xf32> to vector<4x8x32xf32>
    "tpu.trace_start"() <{level = 10 : i32, message = "hqe,hke->hqk"}> : () -> ()
    %cst_20 = arith.constant dense<0.000000e+00> : vector<4x8x8xf32>
    %41 = tpu.matmul %38, %39, %cst_20 {dimension_numbers = #tpu.dot_dimension_numbers<[2], [2], [1], [1], [0, 0, 0, 1, 1, 1], [0], [0]>} : vector<4x8x32xf32>, vector<4x8x32xf32>, vector<4x8x8xf32> -> vector<4x8x8xf32>
    "tpu.trace_stop"() : () -> ()
    %cst_21 = arith.constant dense<0xFF800000> : vector<4x8xf32>
    %42 = vector.multi_reduction <maximumf>, %41, %cst_21 [2] : vector<4x8x8xf32> to vector<4x8xf32>
    %43 = vector.shape_cast %42 : vector<4x8xf32> to vector<4x8x1xf32>
    %44 = vector.broadcast %43 : vector<4x8x1xf32> to vector<4x8x8xf32>
    %45 = arith.subf %41, %44 : vector<4x8x8xf32>
    %46 = math.exp %45 : vector<4x8x8xf32>
    %cst_22 = arith.constant dense<0.000000e+00> : vector<4x8xf32>
    %47 = vector.multi_reduction <add>, %46, %cst_22 [2] : vector<4x8x8xf32> to vector<4x8xf32>
    %48 = vector.shape_cast %47 : vector<4x8xf32> to vector<4x8x1xf32>
    %49 = tpu.reciprocal %48 {approx = true} : vector<4x8x1xf32> -> vector<4x8x1xf32>
    %50 = vector.broadcast %49 : vector<4x8x1xf32> to vector<4x8x8xf32>
    %51 = arith.mulf %46, %50 : vector<4x8x8xf32>
    "tpu.trace_start"() <{level = 10 : i32, message = "hqk,hke->hqe"}> : () -> ()
    %cst_23 = arith.constant dense<0.000000e+00> : vector<4x8x32xf32>
    %52 = tpu.matmul %51, %40, %cst_23 {dimension_numbers = #tpu.dot_dimension_numbers<[2], [1], [1], [2], [0, 0, 0, 1, 1, 2], [0], [0]>} : vector<4x8x8xf32>, vector<4x8x32xf32>, vector<4x8x32xf32> -> vector<4x8x32xf32>
    "tpu.trace_stop"() : () -> ()
    %c0_24 = arith.constant 0 : index
    %c0_25 = arith.constant 0 : index
    %c0_26 = arith.constant 0 : index
    %c0_27 = arith.constant 0 : index
    %53 = vector.load %arg6[%c0_24, %c0_25, %c0_26, %c0_27] : memref<2x4x32x128xf32, #tpu.memory_space<vmem>>, vector<1x4x32x128xf32>
    %54 = vector.shape_cast %53 : vector<1x4x32x128xf32> to vector<4x32x128xf32>
    "tpu.trace_start"() <{level = 10 : i32, message = "hse,hed->hsd"}> : () -> ()
    %cst_28 = arith.constant dense<0.000000e+00> : vector<4x8x128xf32>
    %55 = tpu.matmul %52, %54, %cst_28 {dimension_numbers = #tpu.dot_dimension_numbers<[2], [1], [1], [2], [0, 0, 0, 1, 1, 2], [0], [0]>} : vector<4x8x32xf32>, vector<4x32x128xf32>, vector<4x8x128xf32> -> vector<4x8x128xf32>
    "tpu.trace_stop"() : () -> ()
    %cst_29 = arith.constant dense<0.000000e+00> : vector<8x128xf32>
    %56 = vector.multi_reduction <add>, %55, %cst_29 [0] : vector<4x8x128xf32> to vector<8x128xf32>
    %c0_30 = arith.constant 0 : index
    %c0_31 = arith.constant 0 : index
    %c0_32 = arith.constant 0 : index
    %57 = vector.load %arg7[%c0_30, %c0_31, %c0_32] : memref<2x1x128xf32, #tpu.memory_space<vmem>>, vector<1x1x128xf32>
    %58 = vector.shape_cast %57 : vector<1x1x128xf32> to vector<1x128xf32>
    %59 = vector.broadcast %58 : vector<1x128xf32> to vector<8x128xf32>
    %60 = arith.addf %56, %59 : vector<8x128xf32>
    %61 = arith.addf %25, %60 : vector<8x128xf32>
    %c0_33 = arith.constant 0 : index
    %c0_34 = arith.constant 0 : index
    %c0_35 = arith.constant 0 : index
    %62 = vector.load %arg8[%c0_33, %c0_34, %c0_35] : memref<2x1x128xf32, #tpu.memory_space<vmem>>, vector<1x1x128xf32>
    %63 = vector.shape_cast %62 : vector<1x1x128xf32> to vector<1x128xf32>
    %c0_36 = arith.constant 0 : index
    %c0_37 = arith.constant 0 : index
    %c0_38 = arith.constant 0 : index
    %64 = vector.load %arg9[%c0_36, %c0_37, %c0_38] : memref<2x1x128xf32, #tpu.memory_space<vmem>>, vector<1x1x128xf32>
    %65 = vector.shape_cast %64 : vector<1x1x128xf32> to vector<1x128xf32>
    %cst_39 = arith.constant dense<0.000000e+00> : vector<8xf32>
    %66 = vector.multi_reduction <add>, %61, %cst_39 [1] : vector<8x128xf32> to vector<8xf32>
    %67 = vector.shape_cast %66 : vector<8xf32> to vector<8x1xf32>
    %cst_40 = arith.constant 1.280000e+02 : f32
    %68 = vector.broadcast %cst_40 : f32 to vector<8x1xf32>
    %69 = arith.divf %67, %68 : vector<8x1xf32>
    %70 = vector.broadcast %69 : vector<8x1xf32> to vector<8x128xf32>
    %71 = arith.subf %61, %70 : vector<8x128xf32>
    %72 = arith.mulf %71, %71 : vector<8x128xf32>
    %cst_41 = arith.constant dense<0.000000e+00> : vector<8xf32>
    %73 = vector.multi_reduction <add>, %72, %cst_41 [1] : vector<8x128xf32> to vector<8xf32>
    %74 = vector.shape_cast %73 : vector<8xf32> to vector<8x1xf32>
    %cst_42 = arith.constant 1.280000e+02 : f32
    %75 = vector.broadcast %cst_42 : f32 to vector<8x1xf32>
    %76 = arith.divf %74, %75 : vector<8x1xf32>
    %77 = vector.broadcast %69 : vector<8x1xf32> to vector<8x128xf32>
    %78 = arith.subf %61, %77 : vector<8x128xf32>
    %cst_43 = arith.constant 9.99999974E-6 : f32
    %79 = vector.broadcast %cst_43 : f32 to vector<8x1xf32>
    %80 = arith.addf %76, %79 : vector<8x1xf32>
    %81 = math.rsqrt %80 : vector<8x1xf32>
    %82 = vector.broadcast %81 : vector<8x1xf32> to vector<8x128xf32>
    %83 = arith.mulf %78, %82 : vector<8x128xf32>
    %84 = vector.broadcast %63 : vector<1x128xf32> to vector<8x128xf32>
    %85 = arith.mulf %83, %84 : vector<8x128xf32>
    %86 = vector.broadcast %65 : vector<1x128xf32> to vector<8x128xf32>
    %87 = arith.addf %85, %86 : vector<8x128xf32>
    %c0_44 = arith.constant 0 : index
    %c0_45 = arith.constant 0 : index
    %c0_46 = arith.constant 0 : index
    %88 = vector.load %arg10[%c0_44, %c0_45, %c0_46] : memref<2x128x512xf32, #tpu.memory_space<vmem>>, vector<1x128x512xf32>
    %89 = vector.shape_cast %88 : vector<1x128x512xf32> to vector<128x512xf32>
    %cst_47 = arith.constant dense<0.000000e+00> : vector<8x512xf32>
    %90 = tpu.matmul %87, %89, %cst_47 {dimension_numbers = #tpu.dot_dimension_numbers<[1], [0], [0], [1], [0, 0, 1, 1], [], []>} : vector<8x128xf32>, vector<128x512xf32>, vector<8x512xf32> -> vector<8x512xf32>
    %c0_48 = arith.constant 0 : index
    %c0_49 = arith.constant 0 : index
    %c0_50 = arith.constant 0 : index
    %91 = vector.load %arg11[%c0_48, %c0_49, %c0_50] : memref<2x1x512xf32, #tpu.memory_space<vmem>>, vector<1x1x512xf32>
    %92 = vector.shape_cast %91 : vector<1x1x512xf32> to vector<1x512xf32>
    %93 = vector.broadcast %92 : vector<1x512xf32> to vector<8x512xf32>
    %94 = arith.addf %90, %93 : vector<8x512xf32>
    %cst_51 = arith.constant 5.000000e-01 : f32
    %95 = vector.broadcast %cst_51 : f32 to vector<8x512xf32>
    %96 = arith.mulf %95, %94 : vector<8x512xf32>
    %cst_52 = arith.constant 4.471500e-02 : f32
    %97 = vector.broadcast %cst_52 : f32 to vector<8x512xf32>
    %98 = arith.mulf %97, %94 : vector<8x512xf32>
    %99 = arith.mulf %98, %94 : vector<8x512xf32>
    %100 = arith.mulf %99, %94 : vector<8x512xf32>
    %101 = arith.addf %94, %100 : vector<8x512xf32>
    %cst_53 = arith.constant 0.797884583 : f32
    %102 = vector.broadcast %cst_53 : f32 to vector<8x512xf32>
    %103 = arith.mulf %102, %101 : vector<8x512xf32>
    %104 = math.tanh %103 : vector<8x512xf32>
    %cst_54 = arith.constant 1.000000e+00 : f32
    %105 = vector.broadcast %cst_54 : f32 to vector<8x512xf32>
    %106 = arith.addf %105, %104 : vector<8x512xf32>
    %107 = arith.mulf %96, %106 : vector<8x512xf32>
    %c0_55 = arith.constant 0 : index
    %c0_56 = arith.constant 0 : index
    %c0_57 = arith.constant 0 : index
    %108 = vector.load %arg12[%c0_55, %c0_56, %c0_57] : memref<2x512x128xf32, #tpu.memory_space<vmem>>, vector<1x512x128xf32>
    %109 = vector.shape_cast %108 : vector<1x512x128xf32> to vector<512x128xf32>
    %cst_58 = arith.constant dense<0.000000e+00> : vector<8x128xf32>
    %110 = tpu.matmul %107, %109, %cst_58 {dimension_numbers = #tpu.dot_dimension_numbers<[1], [0], [0], [1], [0, 0, 1, 1], [], []>} : vector<8x512xf32>, vector<512x128xf32>, vector<8x128xf32> -> vector<8x128xf32>
    %c0_59 = arith.constant 0 : index
    %c0_60 = arith.constant 0 : index
    %c0_61 = arith.constant 0 : index
    %111 = vector.load %arg13[%c0_59, %c0_60, %c0_61] : memref<2x1x128xf32, #tpu.memory_space<vmem>>, vector<1x1x128xf32>
    %112 = vector.shape_cast %111 : vector<1x1x128xf32> to vector<1x128xf32>
    %113 = vector.broadcast %112 : vector<1x128xf32> to vector<8x128xf32>
    %114 = arith.addf %110, %113 : vector<8x128xf32>
    %115 = arith.addf %87, %114 : vector<8x128xf32>
    %c0_62 = arith.constant 0 : index
    %c0_63 = arith.constant 0 : index
    %c0_64 = arith.constant 0 : index
    %116 = vector.load %arg14[%c0_62, %c0_63, %c0_64] : memref<2x1x128xf32, #tpu.memory_space<vmem>>, vector<1x1x128xf32>
    %117 = vector.shape_cast %116 : vector<1x1x128xf32> to vector<1x128xf32>
    %c0_65 = arith.constant 0 : index
    %c0_66 = arith.constant 0 : index
    %c0_67 = arith.constant 0 : index
    %118 = vector.load %arg15[%c0_65, %c0_66, %c0_67] : memref<2x1x128xf32, #tpu.memory_space<vmem>>, vector<1x1x128xf32>
    %119 = vector.shape_cast %118 : vector<1x1x128xf32> to vector<1x128xf32>
    %cst_68 = arith.constant dense<0.000000e+00> : vector<8xf32>
    %120 = vector.multi_reduction <add>, %115, %cst_68 [1] : vector<8x128xf32> to vector<8xf32>
    %121 = vector.shape_cast %120 : vector<8xf32> to vector<8x1xf32>
    %cst_69 = arith.constant 1.280000e+02 : f32
    %122 = vector.broadcast %cst_69 : f32 to vector<8x1xf32>
    %123 = arith.divf %121, %122 : vector<8x1xf32>
    %124 = vector.broadcast %123 : vector<8x1xf32> to vector<8x128xf32>
    %125 = arith.subf %115, %124 : vector<8x128xf32>
    %126 = arith.mulf %125, %125 : vector<8x128xf32>
    %cst_70 = arith.constant dense<0.000000e+00> : vector<8xf32>
    %127 = vector.multi_reduction <add>, %126, %cst_70 [1] : vector<8x128xf32> to vector<8xf32>
    %128 = vector.shape_cast %127 : vector<8xf32> to vector<8x1xf32>
    %cst_71 = arith.constant 1.280000e+02 : f32
    %129 = vector.broadcast %cst_71 : f32 to vector<8x1xf32>
    %130 = arith.divf %128, %129 : vector<8x1xf32>
    %131 = vector.broadcast %123 : vector<8x1xf32> to vector<8x128xf32>
    %132 = arith.subf %115, %131 : vector<8x128xf32>
    %cst_72 = arith.constant 9.99999974E-6 : f32
    %133 = vector.broadcast %cst_72 : f32 to vector<8x1xf32>
    %134 = arith.addf %130, %133 : vector<8x1xf32>
    %135 = math.rsqrt %134 : vector<8x1xf32>
    %136 = vector.broadcast %135 : vector<8x1xf32> to vector<8x128xf32>
    %137 = arith.mulf %132, %136 : vector<8x128xf32>
    %138 = vector.broadcast %117 : vector<1x128xf32> to vector<8x128xf32>
    %139 = arith.mulf %137, %138 : vector<8x128xf32>
    %140 = vector.broadcast %119 : vector<1x128xf32> to vector<8x128xf32>
    %141 = arith.addf %139, %140 : vector<8x128xf32>
    %142 = vector.shape_cast %141 : vector<8x128xf32> to vector<1x8x128xf32>
    %143 = vector.shape_cast %142 : vector<1x8x128xf32> to vector<1x8x128xf32>
    %144 = vector.broadcast %143 : vector<1x8x128xf32> to vector<12x8x128xf32>
    %c1 = arith.constant 1 : index
    %c0_73 = arith.constant 0 : index
    %c0_74 = arith.constant 0 : index
    %c0_75 = arith.constant 0 : index
    %145 = vector.load %arg4[%c1, %c0_73, %c0_74, %c0_75] : memref<2x12x32x128xf32, #tpu.memory_space<vmem>>, vector<1x12x32x128xf32>
    %146 = vector.shape_cast %145 : vector<1x12x32x128xf32> to vector<12x32x128xf32>
    "tpu.trace_start"() <{level = 10 : i32, message = "hsd,hed->hse"}> : () -> ()
    %cst_76 = arith.constant dense<0.000000e+00> : vector<12x8x32xf32>
    %147 = tpu.matmul %144, %146, %cst_76 {dimension_numbers = #tpu.dot_dimension_numbers<[2], [2], [1], [1], [0, 0, 0, 1, 1, 1], [0], [0]>} : vector<12x8x128xf32>, vector<12x32x128xf32>, vector<12x8x32xf32> -> vector<12x8x32xf32>
    "tpu.trace_stop"() : () -> ()
    %c1_77 = arith.constant 1 : index
    %c0_78 = arith.constant 0 : index
    %c0_79 = arith.constant 0 : index
    %c0_80 = arith.constant 0 : index
    %148 = vector.load %arg5[%c1_77, %c0_78, %c0_79, %c0_80] : memref<2x12x1x32xf32, #tpu.memory_space<vmem>>, vector<1x12x1x32xf32>
    %149 = vector.shape_cast %148 : vector<1x12x1x32xf32> to vector<12x1x32xf32>
    %150 = vector.broadcast %149 : vector<12x1x32xf32> to vector<12x8x32xf32>
    %151 = arith.addf %147, %150 : vector<12x8x32xf32>
    %152 = vector.extract_strided_slice %151 {offsets = [0, 0, 0], sizes = [4, 8, 32], strides = [1, 1, 1]} : vector<12x8x32xf32> to vector<4x8x32xf32>
    %cst_81 = arith.constant 0.176776692 : f32
    %153 = vector.broadcast %cst_81 : f32 to vector<4x8x32xf32>
    %154 = arith.mulf %152, %153 : vector<4x8x32xf32>
    %155 = vector.extract_strided_slice %151 {offsets = [4, 0, 0], sizes = [4, 8, 32], strides = [1, 1, 1]} : vector<12x8x32xf32> to vector<4x8x32xf32>
    %156 = vector.extract_strided_slice %151 {offsets = [8, 0, 0], sizes = [4, 8, 32], strides = [1, 1, 1]} : vector<12x8x32xf32> to vector<4x8x32xf32>
    "tpu.trace_start"() <{level = 10 : i32, message = "hqe,hke->hqk"}> : () -> ()
    %cst_82 = arith.constant dense<0.000000e+00> : vector<4x8x8xf32>
    %157 = tpu.matmul %154, %155, %cst_82 {dimension_numbers = #tpu.dot_dimension_numbers<[2], [2], [1], [1], [0, 0, 0, 1, 1, 1], [0], [0]>} : vector<4x8x32xf32>, vector<4x8x32xf32>, vector<4x8x8xf32> -> vector<4x8x8xf32>
    "tpu.trace_stop"() : () -> ()
    %cst_83 = arith.constant dense<0xFF800000> : vector<4x8xf32>
    %158 = vector.multi_reduction <maximumf>, %157, %cst_83 [2] : vector<4x8x8xf32> to vector<4x8xf32>
    %159 = vector.shape_cast %158 : vector<4x8xf32> to vector<4x8x1xf32>
    %160 = vector.broadcast %159 : vector<4x8x1xf32> to vector<4x8x8xf32>
    %161 = arith.subf %157, %160 : vector<4x8x8xf32>
    %162 = math.exp %161 : vector<4x8x8xf32>
    %cst_84 = arith.constant dense<0.000000e+00> : vector<4x8xf32>
    %163 = vector.multi_reduction <add>, %162, %cst_84 [2] : vector<4x8x8xf32> to vector<4x8xf32>
    %164 = vector.shape_cast %163 : vector<4x8xf32> to vector<4x8x1xf32>
    %165 = tpu.reciprocal %164 {approx = true} : vector<4x8x1xf32> -> vector<4x8x1xf32>
    %166 = vector.broadcast %165 : vector<4x8x1xf32> to vector<4x8x8xf32>
    %167 = arith.mulf %162, %166 : vector<4x8x8xf32>
    "tpu.trace_start"() <{level = 10 : i32, message = "hqk,hke->hqe"}> : () -> ()
    %cst_85 = arith.constant dense<0.000000e+00> : vector<4x8x32xf32>
    %168 = tpu.matmul %167, %156, %cst_85 {dimension_numbers = #tpu.dot_dimension_numbers<[2], [1], [1], [2], [0, 0, 0, 1, 1, 2], [0], [0]>} : vector<4x8x8xf32>, vector<4x8x32xf32>, vector<4x8x32xf32> -> vector<4x8x32xf32>
    "tpu.trace_stop"() : () -> ()
    %c1_86 = arith.constant 1 : index
    %c0_87 = arith.constant 0 : index
    %c0_88 = arith.constant 0 : index
    %c0_89 = arith.constant 0 : index
    %169 = vector.load %arg6[%c1_86, %c0_87, %c0_88, %c0_89] : memref<2x4x32x128xf32, #tpu.memory_space<vmem>>, vector<1x4x32x128xf32>
    %170 = vector.shape_cast %169 : vector<1x4x32x128xf32> to vector<4x32x128xf32>
    "tpu.trace_start"() <{level = 10 : i32, message = "hse,hed->hsd"}> : () -> ()
    %cst_90 = arith.constant dense<0.000000e+00> : vector<4x8x128xf32>
    %171 = tpu.matmul %168, %170, %cst_90 {dimension_numbers = #tpu.dot_dimension_numbers<[2], [1], [1], [2], [0, 0, 0, 1, 1, 2], [0], [0]>} : vector<4x8x32xf32>, vector<4x32x128xf32>, vector<4x8x128xf32> -> vector<4x8x128xf32>
    "tpu.trace_stop"() : () -> ()
    %cst_91 = arith.constant dense<0.000000e+00> : vector<8x128xf32>
    %172 = vector.multi_reduction <add>, %171, %cst_91 [0] : vector<4x8x128xf32> to vector<8x128xf32>
    %c1_92 = arith.constant 1 : index
    %c0_93 = arith.constant 0 : index
    %c0_94 = arith.constant 0 : index
    %173 = vector.load %arg7[%c1_92, %c0_93, %c0_94] : memref<2x1x128xf32, #tpu.memory_space<vmem>>, vector<1x1x128xf32>
    %174 = vector.shape_cast %173 : vector<1x1x128xf32> to vector<1x128xf32>
    %175 = vector.broadcast %174 : vector<1x128xf32> to vector<8x128xf32>
    %176 = arith.addf %172, %175 : vector<8x128xf32>
    %177 = arith.addf %141, %176 : vector<8x128xf32>
    %c1_95 = arith.constant 1 : index
    %c0_96 = arith.constant 0 : index
    %c0_97 = arith.constant 0 : index
    %178 = vector.load %arg8[%c1_95, %c0_96, %c0_97] : memref<2x1x128xf32, #tpu.memory_space<vmem>>, vector<1x1x128xf32>
    %179 = vector.shape_cast %178 : vector<1x1x128xf32> to vector<1x128xf32>
    %c1_98 = arith.constant 1 : index
    %c0_99 = arith.constant 0 : index
    %c0_100 = arith.constant 0 : index
    %180 = vector.load %arg9[%c1_98, %c0_99, %c0_100] : memref<2x1x128xf32, #tpu.memory_space<vmem>>, vector<1x1x128xf32>
    %181 = vector.shape_cast %180 : vector<1x1x128xf32> to vector<1x128xf32>
    %cst_101 = arith.constant dense<0.000000e+00> : vector<8xf32>
    %182 = vector.multi_reduction <add>, %177, %cst_101 [1] : vector<8x128xf32> to vector<8xf32>
    %183 = vector.shape_cast %182 : vector<8xf32> to vector<8x1xf32>
    %cst_102 = arith.constant 1.280000e+02 : f32
    %184 = vector.broadcast %cst_102 : f32 to vector<8x1xf32>
    %185 = arith.divf %183, %184 : vector<8x1xf32>
    %186 = vector.broadcast %185 : vector<8x1xf32> to vector<8x128xf32>
    %187 = arith.subf %177, %186 : vector<8x128xf32>
    %188 = arith.mulf %187, %187 : vector<8x128xf32>
    %cst_103 = arith.constant dense<0.000000e+00> : vector<8xf32>
    %189 = vector.multi_reduction <add>, %188, %cst_103 [1] : vector<8x128xf32> to vector<8xf32>
    %190 = vector.shape_cast %189 : vector<8xf32> to vector<8x1xf32>
    %cst_104 = arith.constant 1.280000e+02 : f32
    %191 = vector.broadcast %cst_104 : f32 to vector<8x1xf32>
    %192 = arith.divf %190, %191 : vector<8x1xf32>
    %193 = vector.broadcast %185 : vector<8x1xf32> to vector<8x128xf32>
    %194 = arith.subf %177, %193 : vector<8x128xf32>
    %cst_105 = arith.constant 9.99999974E-6 : f32
    %195 = vector.broadcast %cst_105 : f32 to vector<8x1xf32>
    %196 = arith.addf %192, %195 : vector<8x1xf32>
    %197 = math.rsqrt %196 : vector<8x1xf32>
    %198 = vector.broadcast %197 : vector<8x1xf32> to vector<8x128xf32>
    %199 = arith.mulf %194, %198 : vector<8x128xf32>
    %200 = vector.broadcast %179 : vector<1x128xf32> to vector<8x128xf32>
    %201 = arith.mulf %199, %200 : vector<8x128xf32>
    %202 = vector.broadcast %181 : vector<1x128xf32> to vector<8x128xf32>
    %203 = arith.addf %201, %202 : vector<8x128xf32>
    %c1_106 = arith.constant 1 : index
    %c0_107 = arith.constant 0 : index
    %c0_108 = arith.constant 0 : index
    %204 = vector.load %arg10[%c1_106, %c0_107, %c0_108] : memref<2x128x512xf32, #tpu.memory_space<vmem>>, vector<1x128x512xf32>
    %205 = vector.shape_cast %204 : vector<1x128x512xf32> to vector<128x512xf32>
    %cst_109 = arith.constant dense<0.000000e+00> : vector<8x512xf32>
    %206 = tpu.matmul %203, %205, %cst_109 {dimension_numbers = #tpu.dot_dimension_numbers<[1], [0], [0], [1], [0, 0, 1, 1], [], []>} : vector<8x128xf32>, vector<128x512xf32>, vector<8x512xf32> -> vector<8x512xf32>
    %c1_110 = arith.constant 1 : index
    %c0_111 = arith.constant 0 : index
    %c0_112 = arith.constant 0 : index
    %207 = vector.load %arg11[%c1_110, %c0_111, %c0_112] : memref<2x1x512xf32, #tpu.memory_space<vmem>>, vector<1x1x512xf32>
    %208 = vector.shape_cast %207 : vector<1x1x512xf32> to vector<1x512xf32>
    %209 = vector.broadcast %208 : vector<1x512xf32> to vector<8x512xf32>
    %210 = arith.addf %206, %209 : vector<8x512xf32>
    %cst_113 = arith.constant 5.000000e-01 : f32
    %211 = vector.broadcast %cst_113 : f32 to vector<8x512xf32>
    %212 = arith.mulf %211, %210 : vector<8x512xf32>
    %cst_114 = arith.constant 4.471500e-02 : f32
    %213 = vector.broadcast %cst_114 : f32 to vector<8x512xf32>
    %214 = arith.mulf %213, %210 : vector<8x512xf32>
    %215 = arith.mulf %214, %210 : vector<8x512xf32>
    %216 = arith.mulf %215, %210 : vector<8x512xf32>
    %217 = arith.addf %210, %216 : vector<8x512xf32>
    %cst_115 = arith.constant 0.797884583 : f32
    %218 = vector.broadcast %cst_115 : f32 to vector<8x512xf32>
    %219 = arith.mulf %218, %217 : vector<8x512xf32>
    %220 = math.tanh %219 : vector<8x512xf32>
    %cst_116 = arith.constant 1.000000e+00 : f32
    %221 = vector.broadcast %cst_116 : f32 to vector<8x512xf32>
    %222 = arith.addf %221, %220 : vector<8x512xf32>
    %223 = arith.mulf %212, %222 : vector<8x512xf32>
    %c1_117 = arith.constant 1 : index
    %c0_118 = arith.constant 0 : index
    %c0_119 = arith.constant 0 : index
    %224 = vector.load %arg12[%c1_117, %c0_118, %c0_119] : memref<2x512x128xf32, #tpu.memory_space<vmem>>, vector<1x512x128xf32>
    %225 = vector.shape_cast %224 : vector<1x512x128xf32> to vector<512x128xf32>
    %cst_120 = arith.constant dense<0.000000e+00> : vector<8x128xf32>
    %226 = tpu.matmul %223, %225, %cst_120 {dimension_numbers = #tpu.dot_dimension_numbers<[1], [0], [0], [1], [0, 0, 1, 1], [], []>} : vector<8x512xf32>, vector<512x128xf32>, vector<8x128xf32> -> vector<8x128xf32>
    %c1_121 = arith.constant 1 : index
    %c0_122 = arith.constant 0 : index
    %c0_123 = arith.constant 0 : index
    %227 = vector.load %arg13[%c1_121, %c0_122, %c0_123] : memref<2x1x128xf32, #tpu.memory_space<vmem>>, vector<1x1x128xf32>
    %228 = vector.shape_cast %227 : vector<1x1x128xf32> to vector<1x128xf32>
    %229 = vector.broadcast %228 : vector<1x128xf32> to vector<8x128xf32>
    %230 = arith.addf %226, %229 : vector<8x128xf32>
    %231 = arith.addf %203, %230 : vector<8x128xf32>
    %c1_124 = arith.constant 1 : index
    %c0_125 = arith.constant 0 : index
    %c0_126 = arith.constant 0 : index
    %232 = vector.load %arg14[%c1_124, %c0_125, %c0_126] : memref<2x1x128xf32, #tpu.memory_space<vmem>>, vector<1x1x128xf32>
    %233 = vector.shape_cast %232 : vector<1x1x128xf32> to vector<1x128xf32>
    %c1_127 = arith.constant 1 : index
    %c0_128 = arith.constant 0 : index
    %c0_129 = arith.constant 0 : index
    %234 = vector.load %arg15[%c1_127, %c0_128, %c0_129] : memref<2x1x128xf32, #tpu.memory_space<vmem>>, vector<1x1x128xf32>
    %235 = vector.shape_cast %234 : vector<1x1x128xf32> to vector<1x128xf32>
    %cst_130 = arith.constant dense<0.000000e+00> : vector<8xf32>
    %236 = vector.multi_reduction <add>, %231, %cst_130 [1] : vector<8x128xf32> to vector<8xf32>
    %237 = vector.shape_cast %236 : vector<8xf32> to vector<8x1xf32>
    %cst_131 = arith.constant 1.280000e+02 : f32
    %238 = vector.broadcast %cst_131 : f32 to vector<8x1xf32>
    %239 = arith.divf %237, %238 : vector<8x1xf32>
    %240 = vector.broadcast %239 : vector<8x1xf32> to vector<8x128xf32>
    %241 = arith.subf %231, %240 : vector<8x128xf32>
    %242 = arith.mulf %241, %241 : vector<8x128xf32>
    %cst_132 = arith.constant dense<0.000000e+00> : vector<8xf32>
    %243 = vector.multi_reduction <add>, %242, %cst_132 [1] : vector<8x128xf32> to vector<8xf32>
    %244 = vector.shape_cast %243 : vector<8xf32> to vector<8x1xf32>
    %cst_133 = arith.constant 1.280000e+02 : f32
    %245 = vector.broadcast %cst_133 : f32 to vector<8x1xf32>
    %246 = arith.divf %244, %245 : vector<8x1xf32>
    %247 = vector.broadcast %239 : vector<8x1xf32> to vector<8x128xf32>
    %248 = arith.subf %231, %247 : vector<8x128xf32>
    %cst_134 = arith.constant 9.99999974E-6 : f32
    %249 = vector.broadcast %cst_134 : f32 to vector<8x1xf32>
    %250 = arith.addf %246, %249 : vector<8x1xf32>
    %251 = math.rsqrt %250 : vector<8x1xf32>
    %252 = vector.broadcast %251 : vector<8x1xf32> to vector<8x128xf32>
    %253 = arith.mulf %248, %252 : vector<8x128xf32>
    %254 = vector.broadcast %233 : vector<1x128xf32> to vector<8x128xf32>
    %255 = arith.mulf %253, %254 : vector<8x128xf32>
    %256 = vector.broadcast %235 : vector<1x128xf32> to vector<8x128xf32>
    %257 = arith.addf %255, %256 : vector<8x128xf32>
    %c0_135 = arith.constant 0 : index
    %c0_136 = arith.constant 0 : index
    %c0_137 = arith.constant 0 : index
    %258 = vector.load %arg16[%c0_135, %c0_136, %c0_137] : memref<1x8x128xf32, #tpu.memory_space<vmem>>, vector<1x8x128xf32>
    %259 = vector.shape_cast %258 : vector<1x8x128xf32> to vector<8x128xf32>
    %260 = vector.shape_cast %257 : vector<8x128xf32> to vector<1x8x128xf32>
    tpu.vector_store %arg16[%c0_135, %c0_136, %c0_137], %260 {strides = array<i32>} : memref<1x8x128xf32, #tpu.memory_space<vmem>>, vector<1x8x128xf32>,
    return
  }
  func.func @transform_0(%arg0: i32) -> (i32, i32, i32) {
    %c0_i32 = arith.constant 0 : i32
    %c0_i32_0 = arith.constant 0 : i32
    %c0_i32_1 = arith.constant 0 : i32
    return %arg0, %c0_i32, %c0_i32_0 : i32, i32, i32
  }
  func.func @transform_1(%arg0: i32) -> (i32, i32) {
    %c0_i32 = arith.constant 0 : i32
    %c0_i32_0 = arith.constant 0 : i32
    %c0_i32_1 = arith.constant 0 : i32
    return %c0_i32, %c0_i32_0 : i32, i32
  }
  func.func @transform_2(%arg0: i32) -> (i32, i32) {
    %c0_i32 = arith.constant 0 : i32
    %c0_i32_0 = arith.constant 0 : i32
    %c0_i32_1 = arith.constant 0 : i32
    return %c0_i32, %c0_i32_0 : i32, i32
  }
  func.func @transform_3(%arg0: i32) -> (i32, i32, i32, i32) {
    %c0_i32 = arith.constant 0 : i32
    %c0_i32_0 = arith.constant 0 : i32
    %c0_i32_1 = arith.constant 0 : i32
    %c0_i32_2 = arith.constant 0 : i32
    %c0_i32_3 = arith.constant 0 : i32
    return %c0_i32, %c0_i32_0, %c0_i32_1, %c0_i32_2 : i32, i32, i32, i32
  }
  func.func @transform_4(%arg0: i32) -> (i32, i32, i32, i32) {
    %c0_i32 = arith.constant 0 : i32
    %c0_i32_0 = arith.constant 0 : i32
    %c0_i32_1 = arith.constant 0 : i32
    %c0_i32_2 = arith.constant 0 : i32
    %c0_i32_3 = arith.constant 0 : i32
    return %c0_i32, %c0_i32_0, %c0_i32_1, %c0_i32_2 : i32, i32, i32, i32
  }
  func.func @transform_5(%arg0: i32) -> (i32, i32, i32, i32) {
    %c0_i32 = arith.constant 0 : i32
    %c0_i32_0 = arith.constant 0 : i32
    %c0_i32_1 = arith.constant 0 : i32
    %c0_i32_2 = arith.constant 0 : i32
    %c0_i32_3 = arith.constant 0 : i32
    return %c0_i32, %c0_i32_0, %c0_i32_1, %c0_i32_2 : i32, i32, i32, i32
  }
  func.func @transform_6(%arg0: i32) -> (i32, i32, i32) {
    %c0_i32 = arith.constant 0 : i32
    %c0_i32_0 = arith.constant 0 : i32
    %c0_i32_1 = arith.constant 0 : i32
    %c0_i32_2 = arith.constant 0 : i32
    return %c0_i32, %c0_i32_0, %c0_i32_1 : i32, i32, i32
  }
  func.func @transform_7(%arg0: i32) -> (i32, i32, i32) {
    %c0_i32 = arith.constant 0 : i32
    %c0_i32_0 = arith.constant 0 : i32
    %c0_i32_1 = arith.constant 0 : i32
    %c0_i32_2 = arith.constant 0 : i32
    return %c0_i32, %c0_i32_0, %c0_i32_1 : i32, i32, i32
  }
  func.func @transform_8(%arg0: i32) -> (i32, i32, i32) {
    %c0_i32 = arith.constant 0 : i32
    %c0_i32_0 = arith.constant 0 : i32
    %c0_i32_1 = arith.constant 0 : i32
    %c0_i32_2 = arith.constant 0 : i32
    return %c0_i32, %c0_i32_0, %c0_i32_1 : i32, i32, i32
  }
  func.func @transform_9(%arg0: i32) -> (i32, i32, i32) {
    %c0_i32 = arith.constant 0 : i32
    %c0_i32_0 = arith.constant 0 : i32
    %c0_i32_1 = arith.constant 0 : i32
    %c0_i32_2 = arith.constant 0 : i32
    return %c0_i32, %c0_i32_0, %c0_i32_1 : i32, i32, i32
  }
  func.func @transform_10(%arg0: i32) -> (i32, i32, i32) {
    %c0_i32 = arith.constant 0 : i32
    %c0_i32_0 = arith.constant 0 : i32
    %c0_i32_1 = arith.constant 0 : i32
    %c0_i32_2 = arith.constant 0 : i32
    return %c0_i32, %c0_i32_0, %c0_i32_1 : i32, i32, i32
  }
  func.func @transform_11(%arg0: i32) -> (i32, i32, i32) {
    %c0_i32 = arith.constant 0 : i32
    %c0_i32_0 = arith.constant 0 : i32
    %c0_i32_1 = arith.constant 0 : i32
    %c0_i32_2 = arith.constant 0 : i32
    return %c0_i32, %c0_i32_0, %c0_i32_1 : i32, i32, i32
  }
  func.func @transform_12(%arg0: i32) -> (i32, i32, i32) {
    %c0_i32 = arith.constant 0 : i32
    %c0_i32_0 = arith.constant 0 : i32
    %c0_i32_1 = arith.constant 0 : i32
    %c0_i32_2 = arith.constant 0 : i32
    return %c0_i32, %c0_i32_0, %c0_i32_1 : i32, i32, i32
  }
  func.func @transform_13(%arg0: i32) -> (i32, i32, i32) {
    %c0_i32 = arith.constant 0 : i32
    %c0_i32_0 = arith.constant 0 : i32
    %c0_i32_1 = arith.constant 0 : i32
    %c0_i32_2 = arith.constant 0 : i32
    return %c0_i32, %c0_i32_0, %c0_i32_1 : i32, i32, i32
  }
  func.func @transform_14(%arg0: i32) -> (i32, i32, i32) {
    %c0_i32 = arith.constant 0 : i32
    %c0_i32_0 = arith.constant 0 : i32
    %c0_i32_1 = arith.constant 0 : i32
    %c0_i32_2 = arith.constant 0 : i32
    return %c0_i32, %c0_i32_0, %c0_i32_1 : i32, i32, i32
  }
  func.func @transform_15(%arg0: i32) -> (i32, i32, i32) {
    %c0_i32 = arith.constant 0 : i32
    %c0_i32_0 = arith.constant 0 : i32
    %c0_i32_1 = arith.constant 0 : i32
    return %arg0, %c0_i32, %c0_i32_0 : i32, i32, i32
  }
}

</mosaic_0001>

<bundles_post_ra>
// kernel: encoder_forward.1
= control target key start
LH: loop header
LB: loop body
LE: loop exit
PB: predicated region body
PF: predicated region fallthrough
CT: control target
= control target key end

     0   :  { %s4154_s0 = inlined_call_operand.vmem [shape: f32[2,8,128], index: 0, kind: input, shape index: {}]   ;;  %s4155_s1 = inlined_call_operand.vmem [shape: f32[1,128], index: 1, kind: input, shape index: {}]   ;;  %s4156_s2 = inlined_call_operand.hbm [shape: f32[1,128], index: 2, kind: input, shape index: {}]   ;;  %s4157_s3 = inlined_call_operand.hbm [shape: f32[2,12,32,128], index: 3, kind: input, shape index: {}]   ;;  %s4158_s4 = inlined_call_operand.vmem [shape: f32[2,12,1,32], index: 4, kind: input, shape index: {}]   ;;  %s4159_s5 = inlined_call_operand.vmem [shape: f32[2,4,32,128], index: 5, kind: input, shape index: {}]   ;;  %s4160_s6 = inlined_call_operand.vmem [shape: f32[2,1,128], index: 6, kind: input, shape index: {}]   ;;  %s4161_s7 = inlined_call_operand.vmem [shape: f32[2,1,128], index: 7, kind: input, shape index: {}]   ;;  %s4162_s8 = inlined_call_operand.hbm [shape: f32[2,1,128], index: 8, kind: input, shape index: {}]   ;;  %s4163_s9 = inlined_call_operand.hbm [shape: f32[2,128,512], index: 9, kind: input, shape index: {}]   ;;  %s4164_s10 = inlined_call_operand.hbm [shape: f32[2,1,512], index: 10, kind: input, shape index: {}]   ;;  %s4165_s11 = inlined_call_operand.hbm [shape: f32[2,512,128], index: 11, kind: input, shape index: {}]   ;;  %s4166_s12 = inlined_call_operand.hbm [shape: f32[2,1,128], index: 12, kind: input, shape index: {}]   ;;  %s4167_s13 = inlined_call_operand.vmem [shape: f32[2,1,128], index: 13, kind: input, shape index: {}]   ;;  %s4168_s14 = inlined_call_operand.vmem [shape: f32[2,1,128], index: 14, kind: input, shape index: {}]   ;;  %s4169_s15 = inlined_call_operand.hbm [shape: f32[2,8,128], index: 15, kind: output, shape index: {}]  }
   0x1   :  { %4182 = sst [smem:[#allocation28_spill]] %s4157_s3 }
   0x2   :  { %4183 = sst [smem:[#allocation29_spill]] %s4163_s9 }
   0x3   :  { %4184 = sst [smem:[#allocation30_spill]] %s4167_s13 }
   0x4   :  { %4185 = sst [smem:[#allocation31_spill]] %s4168_s14 }
   0x5   :  { %4186 = sst [smem:[#allocation32_spill]] %s4169_s15 }
   0x6   :  { %20 = vsyncpa [#allocation3], 0 }
   0x7   :  { %21 = vsyncpa [#allocation6], 0 }
   0x8   :  { %22 = vsyncpa [#allocation9], 0 }
   0x9   :  { %23 = vsyncpa [#allocation12], 0 }
   0xa   :  { %24 = vsyncpa [#allocation4], 0 }
   0xb   :  { %26 = vsyncpa [#allocation4 + $0x1], 0  ;;  %s3684_s18 = smov 0   ;;  %s3686_s19 = smov 0  }
   0xc   :  { %s3688_s20 = smov 0   ;;  %s3690_s21 = smov 0  }
   0xd LB: > { %4187 = sst [smem:[#allocation20_spill]] %s3574_s18  ;;  %s3705_s22 = sadd.s32 4294967295, %s3586_s21   ;;  %s3586_s21 = sphi %s3690_s21, %s4209_s21   ;;  %s3582_s20 = sphi %s3688_s20, %s4212_s20   ;;  %s3578_s19 = sphi %s3686_s19, %s4211_s19   ;;  %s3574_s18 = sphi %s3684_s18, %s4210_s18  }
   0xe   : > { %4188 = sst [smem:[#allocation21_spill]] %s3578_s19  ;;  %s2993_s23 = sadd.s32 4294967294, %s3586_s21  }
   0xf   : > { %4189 = sst [smem:[#allocation22_spill]] %s3582_s20  ;;  %s3709_s24 = sadd.s32 1, %s3586_s21  }
  0x10   : > { %4190 = sst [smem:[#allocation23_spill]] %s3586_s21  ;;  %s359_s25 = sadd.s32 1, %s3582_s20 }
  0x11   : > { %4191 = sst [smem:[#allocation24_spill]] %s3709_s24  ;;  %s356_s26 = ssub.s32 %s3586_s21, %s3709_s24 }
  0x12   : > { %p369_p0 = scmp.ne.s32.totalorder %s3582_s20, %s3578_s19  ;;  %p357_p1 = scmp.eq.s32.totalorder %s356_s26, 0 }
  0x13   : > { %p370_p2 = scmp.eq.s32.totalorder %s3705_s22, 1  ;;  %p375_p3 = scmp.ne.s32.totalorder %s3578_s19, %s3574_s18 }
  0x14   : > { %p376_p4 = scmp.eq.s32.totalorder %s2993_s23, 1  ;;  %p2994_p7 = scmp.ge.s32.totalorder %s3586_s21, 1 }
  0x15   : > { %s3720_s27 = scalar_select %p357_p1, %s3582_s20, %s359_s25  }
  0x16   : > { %p3722_p5 = por %p370_p2, %p369_p0  ;;  %p3726_p6 = por %p376_p4, %p375_p3 }
  0x17   : > { %4192 = sst [smem:[#allocation25_spill]] %s3720_s27  ;;  %p383_p8 = scmp.lt.s32.totalorder %s3586_s21, 3 }
  0x18   : > { %s4193_s28 = scalar_select %p3722_p5, 1, 0 }
  0x19   : > { %s4195_s29 = scalar_select %p3726_p6, 1, 0 }
  0x1a   : > { %4194 = sst [smem:[#allocation26_spill]] %s4193_s28  ;;  %p3137_p9 = scmp.eq.s32.totalorder %s3705_s22, 0 }
  0x1b   : > { %4196 = sst [smem:[#allocation27_spill]] %s4195_s29  ;;  %p3733_p10 = pnand %p2994_p7, %p383_p8 }
  0x1c   : > { %s4198_s3 = sld [smem:[#allocation28_spill]]  ;;  %s3588_s25 = smov [#allocation5]  }
  0x1d   : > { %p3111_p11 = pneg %p3733_p10  ;;  %s411_s26 = sshll.u32 %s3588_s25, 4  ;;  %s412_s26 = int_to_ptr.vmem [resolvable:$true] %s411_s26 }
  0x1e   : > { %s4200_s9 = sld [smem:[#allocation29_spill]]  ;;  %s3589_s16 = smov 128  }
  0x1f   : > { %p3744_p12 = pnand %p3137_p9, %p3111_p11  ;;  %s3590_s17 = smov 8  }
  0x20   : > { %s3592_s18 = smov 512   ;;  %s3593_s21 = smov 32  }
  0x21   : > { %s477_s20 = sshll.u32 %s4165_s11, 4  ;;  %s3594_s24 = smov [#allocation11]   ;;  %s478_s20 = int_to_ptr.hbm [resolvable:$true] %s477_s20 }
  0x22   : > { %s409_s23 = sshll.u32 %s4198_s3, 4  ;;  %s3591_s3 = smov [#allocation8]   ;;  %s410_s23 = int_to_ptr.hbm [resolvable:$true] %s409_s23 }
  0x23   : > { %3117 = dma.hbm_to_vmem [thread:$0]  (!%p3744_p12), %s410_s23, 12288, %s412_s26, [#allocation6], %s3589_s16, %s3589_s16, %s3590_s17  }
  0x24   : > { %s449_s29 = sshll.u32 %s4200_s9, 4  ;;  %s451_s25 = sshll.u32 %s3591_s3, 4  ;;  %s450_s29 = int_to_ptr.hbm [resolvable:$true] %s449_s29  ;;  %s452_s25 = int_to_ptr.vmem [resolvable:$true] %s451_s25 }
  0x25   : > { %3123 = dma.hbm_to_vmem [thread:$0]  (!%p3744_p12), %s450_s29, 16384, %s452_s25, [#allocation9], %s3592_s18, %s3592_s18, %s3593_s21  }
  0x26   : > { %s479_s9 = sshll.u32 %s3594_s24, 4  ;;  %s398_s23 = sshll.u32 %s4156_s2, 4  ;;  %s480_s9 = int_to_ptr.vmem [resolvable:$true] %s479_s9  ;;  %s399_s23 = int_to_ptr.hbm [resolvable:$true] %s398_s23 }
  0x27   : > { %3129 = dma.hbm_to_vmem [thread:$0]  (!%p3744_p12), %s478_s20, 16384, %s480_s9, [#allocation12], %s3589_s16, %s3589_s16, %s3590_s17  }
  0x28   : > { %s3595_s3 = smov [#allocation2]   ;;  %s435_s21 = sshll.u32 %s4162_s8, 4  ;;  %s436_s21 = int_to_ptr.hbm [resolvable:$true] %s435_s21 }
  0x29   : > { %s400_s26 = sshll.u32 %s3595_s3, 4  ;;  %s3596_s15 = smov [#allocation7]   ;;  %s401_s26 = int_to_ptr.vmem [resolvable:$true] %s400_s26 }
  0x2a   : > { %3114 = dma.hbm_to_vmem [thread:$0]  (!%p3744_p12), %s399_s23, 16, %s401_s26, [#allocation3]  }
  0x2b   : > { %s437_s28 = sshll.u32 %s3596_s15, 4  ;;  %s463_s29 = sshll.u32 %s4164_s10, 4  ;;  %s438_s28 = int_to_ptr.vmem [resolvable:$true] %s437_s28  ;;  %s464_s29 = int_to_ptr.hbm [resolvable:$true] %s463_s29 }
  0x2c   : > { %s3597_s9 = smov 16   ;;  %s3598_s16 = smov 1  }
  0x2d   : > { %3120 = dma.hbm_to_vmem [thread:$0]  (!%p3744_p12), %s436_s21, 32, %s438_s28, [#allocation6], %s3597_s9, %s3597_s9, %s3598_s16  }
  0x2e   : > { %s3599_s13 = smov [#allocation10]   ;;  %s3600_s25 = smov 64  }
  0x2f   : > { %s465_s17 = sshll.u32 %s3599_s13, 4  ;;  %s3601_s20 = smov 4   ;;  %s466_s17 = int_to_ptr.vmem [resolvable:$true] %s465_s17 }
  0x30   : > { %3126 = dma.hbm_to_vmem [thread:$0]  (!%p3744_p12), %s464_s29, 128, %s466_s17, [#allocation9], %s3600_s25, %s3600_s25, %s3601_s20  }
  0x31   : > { %s491_s3 = sshll.u32 %s4166_s12, 4  ;;  %s3602_s26 = smov [#allocation13]   ;;  %s492_s3 = int_to_ptr.hbm [resolvable:$true] %s491_s3 }
  0x32   : > { %s493_s18 = sshll.u32 %s3602_s26, 4  ;;  %522 = sbr.rel (%p3733_p10) target bundleno = 3605 (0xe15), region = 80  ;;  %s494_s18 = int_to_ptr.vmem [resolvable:$true] %s493_s18 }
  0x33   : > { %3132 = dma.hbm_to_vmem [thread:$0]  (!%p3744_p12), %s492_s3, 32, %s494_s18, [#allocation12], %s3597_s9, %s3597_s9, %s3598_s16  }
  0x37   : > { %3553 = dma.done.wait (%p3137_p9), [#allocation3], 16  }
  0x38   : > { %3555 = vsyncadd (%p3137_p9), [#allocation3], 4294967280 }
  0x39   : > { %3557 = dma.done.wait (%p3137_p9), [#allocation6], 12320  }
  0x3a   : > { %3559 = vsyncadd (%p3137_p9), [#allocation6], 4294954976 }
  0x3b   : > { %3561 = dma.done.wait (%p3137_p9), [#allocation9], 16512  }
  0x3c   : > { %3563 = vsyncadd (%p3137_p9), [#allocation9], 4294950784 }
  0x3d   : > { %3565 = dma.done.wait (%p3137_p9), [#allocation12], 16416  }
  0x3e   : > { %3567 = vsyncadd (%p3137_p9), [#allocation12], 4294950880  ;;  %p600_p13 = scmp.lt.s32.totalorder %s3705_s22, 1  ;;  %v3603_v1 = vmov 128.0   ;;  %v645_v12 = vld [vmem:[#allocation5 + $0x18] sm:$0xff]  ;;  %v644_v16 = vld [vmem:[#allocation5 + $0x10] sm:$0xff] }
  0x3f   : > { %3238 = vrcp.f32 %v3603_v1  ;;  %v649_v13 = vld [vmem:[#allocation5 + $0x38] sm:$0xff]  ;;  %750 = vmatpush.xpose.msra.mxu0 %v645_v12  ;;  %v648_v17 = vld [vmem:[#allocation5 + $0x30] sm:$0xff]  ;;  %v643_v20 = vld [vmem:[#allocation5 + $0x8] sm:$0xff]  ;;  %vm982_vm4 = vcmask 261120   ;;  %vm1087_vm5 = vcmask 64512   ;;  %s4201_s25 = sld [smem:[#allocation30_spill]] }
  0x40   : > { %s601_s27 = scalar_select %p600_p13, %s3705_s22, 1  ;;  %v653_v14 = vld [vmem:[#allocation5 + $0x58] sm:$0xff]  ;;  %770 = vmatpush.xpose.msra.mxu1 %v649_v13  ;;  %v652_v18 = vld [vmem:[#allocation5 + $0x50] sm:$0xff]  ;;  %v647_v21 = vld [vmem:[#allocation5 + $0x28] sm:$0xff] }
  0x41   : > { %v657_v15 = vld [vmem:[#allocation5 + $0x78] sm:$0xff]  ;;  %790 = vmatpush.xpose.msra.mxu2 %v653_v14  ;;  %v656_v19 = vld [vmem:[#allocation5 + $0x70] sm:$0xff]  ;;  %v651_v22 = vld [vmem:[#allocation5 + $0x48] sm:$0xff]  ;;  %s4202_s23 = sld [smem:[#allocation31_spill]]  ;;  %s3078_s16 = sshll.u32 %s3705_s22, 3 }
  0x42   : > { %s3012_s30 = sshll.u32 %s601_s27, 3  ;;  %810 = vmatpush.xpose.msra.mxu3 %v657_v15  ;;  %v655_v23 = vld [vmem:[#allocation5 + $0x68] sm:$0xff]  ;;  %v642_v24 = vld [vmem:[#allocation5] sm:$0xff]  ;;  %v661_v28 = vld [vmem:[#allocation5 + $0x98] sm:$0xff]  ;;  %s4203_s19 = sld [smem:[#allocation21_spill]] }
  0x43   : > { %s603_s28 = scalar_lea.vmem %s4154_s0, %s3012_s30  ;;  %751 = vmatpush.xpose.msra.mxu0 %v644_v16  ;;  %v646_v25 = vld [vmem:[#allocation5 + $0x20] sm:$0xff]  ;;  %v665_v29 = vld [vmem:[#allocation5 + $0xb8] sm:$0xff]  ;;  %v660_v32 = vld [vmem:[#allocation5 + $0x90] sm:$0xff]  ;;  %s4204_s3 = sld [smem:[#allocation32_spill]] }
  0x44   : > { %v604_v0 = vld [vmem:[%s603_s28] sm:$0xff]  ;;  %771 = vmatpush.xpose.msra.mxu1 %v648_v17  ;;  %v664_v33 = vld [vmem:[#allocation5 + $0xb0] sm:$0xff]  ;;  %v659_v36 = vld [vmem:[#allocation5 + $0x88] sm:$0xff] }
  0x45   : > { %607 = vadd.xlane.f32.xlu0 %v604_v0  ;;  %v3239_v2 = vpop.eup %3238  ;;  %791 = vmatpush.xpose.msra.mxu2 %v652_v18  ;;  %v650_v26 = vld [vmem:[#allocation5 + $0x40] sm:$0xff]  ;;  %v669_v30 = vld [vmem:[#allocation5 + $0xd8] sm:$0xff]  ;;  %v668_v34 = vld [vmem:[#allocation5 + $0xd0] sm:$0xff] }
  0x46   : > { %v610_v3 = vmul.f32 128.0, %v3239_v2  ;;  %vm614_vm0 = vweird.f32 %v3239_v2  ;;  %811 = vmatpush.xpose.msra.mxu3 %v656_v19  ;;  %v654_v27 = vld [vmem:[#allocation5 + $0x60] sm:$0xff]  ;;  %v673_v31 = vld [vmem:[#allocation5 + $0xf8] sm:$0xff]  ;;  %v672_v35 = vld [vmem:[#allocation5 + $0xf0] sm:$0xff] }
  0x47   : > { %752 = vmatpush.xpose.msra.mxu0 %v643_v20  ;;  %v663_v37 = vld [vmem:[#allocation5 + $0xa8] sm:$0xff]  ;;  %v658_v40 = vld [vmem:[#allocation5 + $0x80] sm:$0xff]  ;;  %v3200_v53 = vld [vmem:[%s4155_s1] ss:$0 sm:$0xff] }
  0x48   : > { %v611_v4 = vsub.f32 1.0, %v610_v3  ;;  %772 = vmatpush.xpose.msra.mxu1 %v647_v21  ;;  %v667_v38 = vld [vmem:[#allocation5 + $0xc8] sm:$0xff]  ;;  %v662_v41 = vld [vmem:[#allocation5 + $0xa0] sm:$0xff]  ;;  %v3201_v55 = vld [vmem:[#allocation2] ss:$0 sm:$0xff]  ;;  %s597_s29 = sand.u32 1, %s4203_s19  }
  0x49   : > { %792 = vmatpush.xpose.msra.mxu2 %v651_v22  ;;  %v671_v39 = vld [vmem:[#allocation5 + $0xe8] sm:$0xff]  ;;  %v666_v42 = vld [vmem:[#allocation5 + $0xc0] sm:$0xff]  ;;  %v677_v59 = vld [vmem:[#allocation5 + $0x118] sm:$0xff]  ;;  %s3011_s9 = sshll.u32 %s597_s29, 3  ;;  %s2860_s26 = scalar_lea.hbm %s4204_s3, %s3078_s16 }
  0x4a   : > { %v612_v5 = vmul.f32 %v3239_v2, %v611_v4  ;;  %812 = vmatpush.xpose.msra.mxu3 %v655_v23  ;;  %v670_v43 = vld [vmem:[#allocation5 + $0xe0] sm:$0xff]  ;;  %v681_v60 = vld [vmem:[#allocation5 + $0x138] sm:$0xff]  ;;  %v676_v63 = vld [vmem:[#allocation5 + $0x110] sm:$0xff]  ;;  %s599_s21 = scalar_lea.vmem [#allocation14], %s3011_s9  ;;  %s2864_s15 = sshll.u32 %s2860_s26, 4  ;;  %s2865_s15 = int_to_ptr.hbm [resolvable:$true] %s2864_s15 }
  0x4b   : > { %753 = vmatpush.xpose.msra.mxu0 %v642_v24  ;;  %v685_v61 = vld [vmem:[#allocation5 + $0x158] sm:$0xff]  ;;  %v684_v1 = vld [vmem:[#allocation5 + $0x150] sm:$0xff]  ;;  %v675_v3 = vld [vmem:[#allocation5 + $0x108] sm:$0xff]  ;;  %s2862_s22 = sshll.u32 %s599_s21, 4  ;;  %s2850_s28 = scalar_lea.sflag [#allocation4], %s597_s29  ;;  %s2863_s22 = int_to_ptr.vmem [resolvable:$true] %s2862_s22 }
  0x4c   : > { %v613_v6 = vadd.f32 %v3239_v2, %v612_v5  ;;  %773 = vmatpush.xpose.msra.mxu1 %v646_v25  ;;  %v689_v62 = vld [vmem:[#allocation5 + $0x178] sm:$0xff]  ;;  %v679_v4 = vld [vmem:[#allocation5 + $0x128] sm:$0xff]  ;;  %v3206_v16 = vld [vmem:[%s4158_s4 + $0x4] ss:$0 sm:$0xff]  ;;  %s3522_s14 = sshra.s32 %s2865_s15, 4  ;;  %s3528_s17 = scalar_lea.hbm %s4204_s3, 16  ;;  %s3523_s14 = int_to_ptr.hbm [resolvable:$true] %s3522_s14 }
  0x4d   : > { %793 = vmatpush.xpose.msra.mxu2 %v650_v26  ;;  %v683_v5 = vld [vmem:[#allocation5 + $0x148] sm:$0xff]  ;;  %v3202_v14 = vld [vmem:[%s4158_s4] ss:$0 sm:$0xff]  ;;  %v3203_v15 = vld [vmem:[%s4158_s4 + $0x1] ss:$0 sm:$0xff]  ;;  %s3524_s19 = scalar_lea.hbm %s3523_s14, 8  ;;  %p3529_p3 = scmp.lt.s32.totalorder %s3523_s14, %s4204_s3 }
  0x4e   : > { %v3803_v7 = vsel %vm614_vm0, %v3239_v2, %v613_v6  ;;  %813 = vmatpush.xpose.msra.mxu3 %v654_v27  ;;  %v688_v2 = vld [vmem:[#allocation5 + $0x170] sm:$0xff]  ;;  %v687_v6 = vld [vmem:[#allocation5 + $0x168] sm:$0xff]  ;;  %v3207_v17 = vld [vmem:[%s4158_s4 + $0x5] ss:$0 sm:$0xff]  ;;  %p3525_p0 = scmp.ne.s32.totalorder %s3523_s14, %s3524_s19  ;;  %p3530_p4 = scmp.lt.s32.totalorder %s3528_s17, %s3524_s19 }
  0x4f   : > { %830 = vmatpush.xpose.msrb.mxu0 %v661_v28  ;;  %v3204_v26 = vld [vmem:[%s4158_s4 + $0x2] ss:$0 sm:$0xff]  ;;  %v3205_v27 = vld [vmem:[%s4158_s4 + $0x3] ss:$0 sm:$0xff]  ;;  %v3208_v28 = vld [vmem:[%s4158_s4 + $0x6] ss:$0 sm:$0xff] }
  0x50   : > { %850 = vmatpush.xpose.msrb.mxu1 %v665_v29  ;;  %p3526_p1 = pnand %p3525_p0, %p3722_p5  ;;  %p3531_p7 = por %p3530_p4, %p3529_p3 }
  0x51   : > { %870 = vmatpush.xpose.msrb.mxu2 %v669_v30 }
  0x52   : > { %890 = vmatpush.xpose.msrb.mxu3 %v673_v31  ;;  %v3209_v31 = vld [vmem:[%s4158_s4 + $0x7] ss:$0 sm:$0xff]  ;;  %p3527_p2 = pneg %p3526_p1 }
  0x53   : > { %831 = vmatpush.xpose.msrb.mxu0 %v660_v32  ;;  %v3210_v32 = vld [vmem:[%s4158_s4 + $0x8] ss:$0 sm:$0xff] }
  0x54   : > { %851 = vmatpush.xpose.msrb.mxu1 %v664_v33  ;;  %v3211_v33 = vld [vmem:[%s4158_s4 + $0x9] ss:$0 sm:$0xff]  ;;  %p3532_p8 = pnand %p3531_p7, %p3527_p2 }
  0x55   : > { %871 = vmatpush.xpose.msrb.mxu2 %v668_v34 }
  0x56   : > { %891 = vmatpush.xpose.msrb.mxu3 %v672_v35 }
  0x57   : > { %832 = vmatpush.xpose.msrb.mxu0 %v659_v36 }
  0x58   : > { %852 = vmatpush.xpose.msrb.mxu1 %v663_v37 }
  0x59   : > { %872 = vmatpush.xpose.msrb.mxu2 %v667_v38 }
  0x5a   : > { %892 = vmatpush.xpose.msrb.mxu3 %v671_v39 }
  0x5b   : > { %833 = vmatpush.xpose.msrb.mxu0 %v658_v40 }
  0x5c   : > { %853 = vmatpush.xpose.msrb.mxu1 %v662_v41 }
  0x5d   : > { %873 = vmatpush.xpose.msrb.mxu2 %v666_v42 }
  0x5e   : > { %893 = vmatpush.xpose.msrb.mxu3 %v670_v43 }
  0xb8   : > { %v608_v8 = vpop.xlane.xlu0 %607 }
  0xb9   : > { %v616_v9 = vmul.f32 %v3803_v7, %v608_v8  ;;  %v674_v8 = vld [vmem:[#allocation5 + $0x100] sm:$0xff] }
  0xbb   : > { %v3806_v10 = vsub.f32 %v604_v0, %v616_v9  ;;  %v680_v0 = vld [vmem:[#allocation5 + $0x130] sm:$0xff]  ;;  %v678_v9 = vld [vmem:[#allocation5 + $0x120] sm:$0xff] }
  0xbd   : > { %v618_v11 = vmul.f32 %v3806_v10, %v3806_v10 }
  0xbf   : > { %619 = vadd.xlane.f32.xlu0 %v618_v11  ;;  %v686_v11 = vld [vmem:[#allocation5 + $0x160] sm:$0xff] }
 0x132   : > { %v620_v44 = vpop.xlane.xlu0 %619 }
 0x133   : > { %v621_v45 = vmul.f32 %v620_v44, %v3803_v7 }
 0x135   : > { %v622_v46 = vadd.f32 1e-05, %v621_v45 }
 0x137   : > { %3240 = vrsqrt.f32 %v622_v46  ;;  %vm629_vm2 = vweird.f32 %v622_v46 }
 0x13d   : > { %v3241_v47 = vpop.eup %3240 }
 0x13e   : > { %v624_v48 = vmul.f32 %v3241_v47, %v622_v46  ;;  %vm630_vm1 = vweird.f32 %v3241_v47  ;;  %v3212_v46 = vld [vmem:[%s4158_s4 + $0xa] ss:$0 sm:$0xff] }
 0x13f   : > { %vm631_vm3 = vmor %vm629_vm2, %vm630_vm1 }
 0x140   : > { %v625_v49 = vmul.f32 %v3241_v47, %v624_v48 }
 0x142   : > { %v626_v50 = vmul.f32 0.5, %v625_v49 }
 0x144   : > { %v627_v51 = vsub.f32 1.5, %v626_v50 }
 0x146   : > { %v628_v52 = vmul.f32 %v3241_v47, %v627_v51 }
 0x148   : > { %v632_v54 = vsel %vm631_vm3, %v3241_v47, %v628_v52  ;;  %v3213_v47 = vld [vmem:[%s4158_s4 + $0xb] ss:$0 sm:$0xff] }
 0x149   : > { %v633_v56 = vmul.f32 %v632_v54, %v3806_v10  ;;  %v682_v10 = vld [vmem:[#allocation5 + $0x140] sm:$0xff] }
 0x14b   : > { %v637_v57 = vmul.f32 %v3200_v53, %v633_v56 }
 0x14d   : > { %v3815_v58 = vadd.f32 %v3201_v55, %v637_v57 }
 0x14f   : > { %754 = vmatmul.f32.vlgmr.msra.gmra.mxu0 %v3815_v58  ;;  %774 = vmatmul.f32.vlgmr.msra.gmra.mxu1 %v3815_v58 }
 0x150   : > { %794 = vmatmul.f32.vlgmr.msra.gmra.mxu2 %v3815_v58  ;;  %814 = vmatmul.f32.vlgmr.msra.gmra.mxu3 %v3815_v58 }
 0x151   : > { %910 = vmatpush.xpose.msra.mxu0 %v677_v59  ;;  %930 = vmatpush.xpose.msra.mxu1 %v681_v60 }
 0x152   : > { %950 = vmatpush.xpose.msra.mxu2 %v685_v61  ;;  %970 = vmatpush.xpose.msra.mxu3 %v689_v62 }
 0x155   : > { %911 = vmatpush.xpose.msra.mxu0 %v676_v63  ;;  %931 = vmatpush.xpose.msra.mxu1 %v680_v0 }
 0x156   : > { %951 = vmatpush.xpose.msra.mxu2 %v684_v1  ;;  %971 = vmatpush.xpose.msra.mxu3 %v688_v2 }
 0x157   : > { %834 = vmatmul.f32.vlgmr.msrb.gmra.mxu0 %v3815_v58  ;;  %854 = vmatmul.f32.vlgmr.msrb.gmra.mxu1 %v3815_v58 }
 0x158   : > { %874 = vmatmul.f32.vlgmr.msrb.gmra.mxu2 %v3815_v58  ;;  %894 = vmatmul.f32.vlgmr.msrb.gmra.mxu3 %v3815_v58 }
 0x159   : > { %912 = vmatpush.xpose.msra.mxu0 %v675_v3  ;;  %932 = vmatpush.xpose.msra.mxu1 %v679_v4 }
 0x15a   : > { %952 = vmatpush.xpose.msra.mxu2 %v683_v5  ;;  %972 = vmatpush.xpose.msra.mxu3 %v687_v6 }
 0x15d   : > { %913 = vmatpush.xpose.msra.mxu0 %v674_v8  ;;  %933 = vmatpush.xpose.msra.mxu1 %v678_v9 }
 0x15e   : > { %953 = vmatpush.xpose.msra.mxu2 %v682_v10  ;;  %973 = vmatpush.xpose.msra.mxu3 %v686_v11 }
 0x160   : > { %914 = vmatmul.f32.vlgmr.msra.gmra.mxu0 %v3815_v58  ;;  %934 = vmatmul.f32.vlgmr.msra.gmra.mxu1 %v3815_v58 }
 0x161   : > { %954 = vmatmul.f32.vlgmr.msra.gmra.mxu2 %v3815_v58  ;;  %974 = vmatmul.f32.vlgmr.msra.gmra.mxu3 %v3815_v58 }
 0x1cc   : > { %v755_v12 = vpop.f32.mrf.mxu0  ;;  %v775_v13 = vpop.f32.mrf.mxu1 }
 0x1cd   : > { %v756_v20 = vadd.f32 %v3202_v14, %v755_v12  ;;  %v776_v21 = vadd.f32 %v3203_v15, %v775_v13 }
 0x1cf   : > { %v978_v29 = vmul.f32 0.17677669, %v756_v20  ;;  %v979_v30 = vmul.f32 0.17677669, %v776_v21  ;;  %v1226_v20 = vld [vmem:[%s4159_s5 + $0x10] sm:$0xff]  ;;  %v1225_v21 = vld [vmem:[%s4159_s5 + $0x8] sm:$0xff] }
 0x1d3   : > { %v795_v18 = vpop.f32.mrf.mxu2  ;;  %v815_v19 = vpop.f32.mrf.mxu3 }
 0x1d4   : > { %v835_v22 = vpop.f32.mrf.mxu0  ;;  %v855_v23 = vpop.f32.mrf.mxu1  ;;  %v796_v34 = vadd.f32 %v3204_v26, %v795_v18  ;;  %v816_v35 = vadd.f32 %v3205_v27, %v815_v19  ;;  %v1227_v19 = vld [vmem:[%s4159_s5 + $0x18] sm:$0xff] }
 0x1d5   : > { %v836_v24 = vadd.f32 %v3206_v16, %v835_v22  ;;  %v856_v25 = vadd.f32 %v3207_v17, %v855_v23 }
 0x1d6   : > { %v980_v44 = vmul.f32 0.17677669, %v796_v34  ;;  %v981_v45 = vmul.f32 0.17677669, %v816_v35  ;;  %v1235_v34 = vld [vmem:[%s4159_s5 + $0x58] sm:$0xff] }
 0x1d7   : > { %3013 = vmatpush.xpose.msk.msrb.mxu0 %vm982_vm4, %v836_v24  ;;  %3015 = vmatpush.xpose.msk.msrb.mxu1 %vm982_vm4, %v856_v25  ;;  %v1231_v35 = vld [vmem:[%s4159_s5 + $0x38] sm:$0xff] }
 0x1da   : > { %3014 = vmatmul.msk.f32.vlgmr.msrb.gmra.mxu0 %vm982_vm4, %v978_v29  ;;  %3016 = vmatmul.msk.f32.vlgmr.msrb.gmra.mxu1 %vm982_vm4, %v979_v30 }
 0x1db   : > { %v875_v36 = vpop.f32.mrf.mxu2  ;;  %v895_v37 = vpop.f32.mrf.mxu3 }
 0x1dc   : > { %v876_v38 = vadd.f32 %v3208_v28, %v875_v36  ;;  %v896_v39 = vadd.f32 %v3209_v31, %v895_v37  ;;  %v1234_v36 = vld [vmem:[%s4159_s5 + $0x50] sm:$0xff] }
 0x1dd   : > { %v915_v40 = vpop.f32.mrf.mxu0  ;;  %v935_v41 = vpop.f32.mrf.mxu1  ;;  %v1230_v37 = vld [vmem:[%s4159_s5 + $0x30] sm:$0xff] }
 0x1de   : > { %v916_v42 = vadd.f32 %v3210_v32, %v915_v40  ;;  %v936_v43 = vadd.f32 %v3211_v33, %v935_v41  ;;  %3017 = vmatpush.xpose.msk.msrb.mxu2 %vm982_vm4, %v876_v38  ;;  %3019 = vmatpush.xpose.msk.msrb.mxu3 %vm982_vm4, %v896_v39  ;;  %v1224_v33 = vld [vmem:[%s4159_s5] sm:$0xff]  ;;  %v1233_v38 = vld [vmem:[%s4159_s5 + $0x48] sm:$0xff] }
 0x1df   : > { %v1229_v39 = vld [vmem:[%s4159_s5 + $0x28] sm:$0xff]  ;;  %v1232_v40 = vld [vmem:[%s4159_s5 + $0x40] sm:$0xff] }
 0x1e0   : > { %1150 = vmatpush.msra.mxu0 %v916_v42  ;;  %1173 = vmatpush.msra.mxu1 %v936_v43  ;;  %v1228_v41 = vld [vmem:[%s4159_s5 + $0x20] sm:$0xff]  ;;  %v1239_v42 = vld [vmem:[%s4159_s5 + $0x78] sm:$0xff]  ;;  %v1238_v43 = vld [vmem:[%s4159_s5 + $0x70] sm:$0xff] }
 0x1e1   : > { %3018 = vmatmul.msk.f32.vlgmr.msrb.gmra.mxu2 %vm982_vm4, %v980_v44  ;;  %3020 = vmatmul.msk.f32.vlgmr.msrb.gmra.mxu3 %vm982_vm4, %v981_v45  ;;  %v1237_v44 = vld [vmem:[%s4159_s5 + $0x68] sm:$0xff]  ;;  %v1236_v45 = vld [vmem:[%s4159_s5 + $0x60] sm:$0xff] }
 0x1e2   : > { %1255 = vmatpush.msrb.mxu0 %v1227_v19  ;;  %1278 = vmatpush.msrb.mxu1 %v1231_v35  ;;  %v1417_v19 = vld [vmem:[#allocation8 + $0x170] sm:$0xff] }
 0x1e3   : > { %v1401_v35 = vld [vmem:[#allocation8 + $0xf0] sm:$0xff] }
 0x1e4   : > { %v955_v48 = vpop.f32.mrf.mxu2  ;;  %v975_v49 = vpop.f32.mrf.mxu3  ;;  %1256 = vmatpush.msrb.mxu0 %v1226_v20  ;;  %1279 = vmatpush.msrb.mxu1 %v1230_v37  ;;  %v1418_v20 = vld [vmem:[#allocation8 + $0x178] sm:$0xff]  ;;  %v1395_v37 = vld [vmem:[#allocation8 + $0xc0] sm:$0xff] }
 0x1e5   : > { %v956_v50 = vadd.f32 %v3212_v46, %v955_v48  ;;  %v976_v51 = vadd.f32 %v3213_v47, %v975_v49 }
 0x1e6   : > { %1257 = vmatpush.msrb.mxu0 %v1225_v21  ;;  %1280 = vmatpush.msrb.mxu1 %v1229_v39  ;;  %v1411_v21 = vld [vmem:[#allocation8 + $0x140] sm:$0xff]  ;;  %v1397_v39 = vld [vmem:[#allocation8 + $0xd0] sm:$0xff] }
 0x1e7   : > { %1196 = vmatpush.msra.mxu2 %v956_v50  ;;  %1219 = vmatpush.msra.mxu3 %v976_v51 }
 0x1e8   : > { %1258 = vmatpush.msrb.mxu0 %v1224_v33  ;;  %1281 = vmatpush.msrb.mxu1 %v1228_v41  ;;  %v1399_v33 = vld [vmem:[#allocation8 + $0xe0] sm:$0xff] }
 0x1e9   : > { %1301 = vmatpush.msrb.mxu2 %v1235_v34  ;;  %1324 = vmatpush.msrb.mxu3 %v1239_v42  ;;  %v1400_v34 = vld [vmem:[#allocation8 + $0xe8] sm:$0xff]  ;;  %v1391_v41 = vld [vmem:[#allocation8 + $0xa0] sm:$0xff] }
 0x1ea   : > { %v1392_v42 = vld [vmem:[#allocation8 + $0xa8] sm:$0xff] }
 0x1eb   : > { %1302 = vmatpush.msrb.mxu2 %v1234_v36  ;;  %1325 = vmatpush.msrb.mxu3 %v1238_v43  ;;  %v1402_v36 = vld [vmem:[#allocation8 + $0xf8] sm:$0xff]  ;;  %v1393_v43 = vld [vmem:[#allocation8 + $0xb0] sm:$0xff] }
 0x1ed   : > { %1303 = vmatpush.msrb.mxu2 %v1233_v38  ;;  %1326 = vmatpush.msrb.mxu3 %v1237_v44  ;;  %v1396_v38 = vld [vmem:[#allocation8 + $0xc8] sm:$0xff]  ;;  %v1394_v44 = vld [vmem:[#allocation8 + $0xb8] sm:$0xff] }
 0x1ef   : > { %1304 = vmatpush.msrb.mxu2 %v1232_v40  ;;  %1327 = vmatpush.msrb.mxu3 %v1236_v45  ;;  %v1398_v40 = vld [vmem:[#allocation8 + $0xd8] sm:$0xff]  ;;  %v1387_v45 = vld [vmem:[#allocation8 + $0x80] sm:$0xff] }
 0x257   : > { %v1006_v52 = vpop.f32.mrf.mxu0  ;;  %v1032_v54 = vpop.f32.mrf.mxu1 }
 0x258   : > { %v1088_v53 = vsel %vm1087_vm5, %v1006_v52, -inf  ;;  %v1091_v55 = vsel %vm1087_vm5, %v1032_v54, -inf }
 0x259   : > { %1089 = vmax.xlane.f32.xlu2 %v1088_v53 }
 0x261   : > { %1092 = vmax.xlane.f32.xlu2 %v1091_v55  ;;  %v3214_v55 = vld [vmem:[%s4160_s6] ss:$0 sm:$0xff] }
 0x264   : > { %v1058_v56 = vpop.f32.mrf.mxu2  ;;  %v1084_v59 = vpop.f32.mrf.mxu3 }
 0x265   : > { %v1094_v57 = vsel %vm1087_vm5, %v1058_v56, -inf  ;;  %v1097_v60 = vsel %vm1087_vm5, %v1084_v59, -inf }
 0x266   : > { %1095 = vmax.xlane.f32.xlu1 %v1094_v57 }
 0x26e   : > { %1098 = vmax.xlane.f32.xlu1 %v1097_v60 }
 0x2cc   : > { %v1090_v61 = vpop.xlane.xlu2 %1089 }
 0x2cd   : > { %v1100_v62 = vsub.f32 %v1006_v52, %v1090_v61  ;;  %v1431_v61 = vld [vmem:[#allocation8 + $0x1e0] sm:$0xff] }
 0x2cf   : > { %v1104_v63 = vmul.f32 1.442695, %v1100_v62  ;;  %v1432_v62 = vld [vmem:[#allocation8 + $0x1e8] sm:$0xff] }
 0x2d1   : > { %3242 = vpow2.f32 %v1104_v63  ;;  %v1433_v63 = vld [vmem:[#allocation8 + $0x1f0] sm:$0xff] }
 0x2d4   : > { %v1093_v2 = vpop.xlane.xlu2 %1092 }
 0x2d5   : > { %v1101_v5 = vsub.f32 %v1032_v54, %v1093_v2  ;;  %v1428_v2 = vld [vmem:[#allocation8 + $0x1c8] sm:$0xff] }
 0x2d7   : > { %v3243_v0 = vpop.eup %3242  ;;  %v1106_v8 = vmul.f32 1.442695, %v1101_v5 }
 0x2d8   : > { %v1112_v1 = vsel %vm1087_vm5, %v3243_v0, 0.0 }
 0x2d9   : > { %v1096_v3 = vpop.xlane.xlu1 %1095  ;;  %1113 = vadd.xlane.f32.xlu2 %v1112_v1  ;;  %v1427_v1 = vld [vmem:[#allocation8 + $0x1c0] sm:$0xff] }
 0x2da   : > { %v1102_v4 = vsub.f32 %v1058_v56, %v1096_v3  ;;  %v1429_v3 = vld [vmem:[#allocation8 + $0x1d0] sm:$0xff] }
 0x2dc   : > { %v1108_v6 = vmul.f32 1.442695, %v1102_v4  ;;  %v1430_v4 = vld [vmem:[#allocation8 + $0x1d8] sm:$0xff] }
 0x2de   : > { %3244 = vpow2.f32 %v1108_v6 }
 0x2df   : > { %3246 = vpow2.f32 %v1106_v8 }
 0x2e1   : > { %v1099_v9 = vpop.xlane.xlu1 %1098 }
 0x2e2   : > { %v1103_v10 = vsub.f32 %v1084_v59, %v1099_v9  ;;  %v1423_v9 = vld [vmem:[#allocation8 + $0x1a0] sm:$0xff] }
 0x2e4   : > { %v3245_v11 = vpop.eup %3244  ;;  %v1110_v12 = vmul.f32 1.442695, %v1103_v10  ;;  %v1424_v10 = vld [vmem:[#allocation8 + $0x1a8] sm:$0xff] }
 0x2e5   : > { %v1118_v13 = vsel %vm1087_vm5, %v3245_v11, 0.0  ;;  %v3247_v14 = vpop.eup %3246 }
 0x2e6   : > { %3248 = vpow2.f32 %v1110_v12  ;;  %1119 = vadd.xlane.f32.xlu0 %v1118_v13  ;;  %v1115_v17 = vsel %vm1087_vm5, %v3247_v14, 0.0  ;;  %v1426_v12 = vld [vmem:[#allocation8 + $0x1b8] sm:$0xff]  ;;  %v1419_v13 = vld [vmem:[#allocation8 + $0x180] sm:$0xff] }
 0x2ec   : > { %v3249_v15 = vpop.eup %3248 }
 0x2ed   : > { %v1121_v16 = vsel %vm1087_vm5, %v3249_v15, 0.0 }
 0x2ee   : > { %1122 = vadd.xlane.f32.xlu1 %v1121_v16  ;;  %1116 = vadd.xlane.f32.xlu0 %v1115_v17  ;;  %v1422_v16 = vld [vmem:[#allocation8 + $0x198] sm:$0xff]  ;;  %v1415_v17 = vld [vmem:[#allocation8 + $0x160] sm:$0xff] }
 0x34c   : > { %v1114_v18 = vpop.xlane.xlu2 %1113 }
 0x34d   : > { %3250 = vrcp.f32 %v1114_v18  ;;  %v1416_v18 = vld [vmem:[#allocation8 + $0x168] sm:$0xff] }
 0x353   : > { %v3251_v22 = vpop.eup %3250 }
 0x354   : > { %v1128_v23 = vmul.f32 %v3251_v22, %v3243_v0  ;;  %v1434_v0 = vld [vmem:[#allocation8 + $0x1f8] sm:$0xff]  ;;  %v1412_v22 = vld [vmem:[#allocation8 + $0x148] sm:$0xff] }
 0x356   : > { %3021 = vmatmul.msk.f32.vlgmr.msra.gmra.mxu0 %vm1087_vm5, %v1128_v23  ;;  %v1413_v23 = vld [vmem:[#allocation8 + $0x150] sm:$0xff] }
 0x357   : > { %1445 = vmatpush.msra.mxu0 %v1431_v61  ;;  %v1378_v61 = vld [vmem:[#allocation8 + $0x38] sm:$0xff] }
 0x359   : > { %v1120_v24 = vpop.xlane.xlu0 %1119  ;;  %1446 = vmatpush.msra.mxu0 %v1427_v1  ;;  %v1374_v1 = vld [vmem:[#allocation8 + $0x18] sm:$0xff] }
 0x35a   : > { %3252 = vrcp.f32 %v1120_v24  ;;  %v1414_v24 = vld [vmem:[#allocation8 + $0x158] sm:$0xff] }
 0x35b   : > { %1447 = vmatpush.msra.mxu0 %v1423_v9  ;;  %v1590_v9 = vld [vmem:[#allocation11 + $0xe8] sm:$0xff] }
 0x35d   : > { %1448 = vmatpush.msra.mxu0 %v1419_v13  ;;  %v1573_v13 = vld [vmem:[#allocation11 + $0x60] sm:$0xff] }
 0x35f   : > { %1449 = vmatpush.msra.mxu0 %v1415_v17 }
 0x360   : > { %v3253_v25 = vpop.eup %3252 }
 0x361   : > { %v1130_v26 = vmul.f32 %v3253_v25, %v3245_v11  ;;  %v1123_v27 = vpop.xlane.xlu1 %1122  ;;  %v1117_v28 = vpop.xlane.xlu0 %1116  ;;  %v1425_v11 = vld [vmem:[#allocation8 + $0x1b0] sm:$0xff]  ;;  %1450 = vmatpush.msra.mxu0 %v1411_v21  ;;  %v1407_v25 = vld [vmem:[#allocation8 + $0x120] sm:$0xff] }
 0x362   : > { %3254 = vrcp.f32 %v1123_v27  ;;  %v1409_v27 = vld [vmem:[#allocation8 + $0x130] sm:$0xff] }
 0x363   : > { %3256 = vrcp.f32 %v1117_v28  ;;  %3023 = vmatmul.msk.f32.vlgmr.msra.gmra.mxu2 %vm1087_vm5, %v1130_v26  ;;  %v1408_v26 = vld [vmem:[#allocation8 + $0x128] sm:$0xff]  ;;  %1451 = vmatpush.msra.mxu0 %v1407_v25  ;;  %v1410_v28 = vld [vmem:[#allocation8 + $0x138] sm:$0xff] }
 0x364   : > { %1485 = vmatpush.msra.mxu2 %v1433_v63  ;;  %v1372_v63 = vld [vmem:[#allocation8 + $0x8] sm:$0xff]  ;;  %v3216_v25 = vld [vmem:[#allocation7] ss:$0 sm:$0xff] }
 0x366   : > { %1486 = vmatpush.msra.mxu2 %v1429_v3  ;;  %v1592_v3 = vld [vmem:[#allocation11 + $0xf8] sm:$0xff] }
 0x368   : > { %v3255_v29 = vpop.eup %3254  ;;  %1487 = vmatpush.msra.mxu2 %v1425_v11 }
 0x369   : > { %v3257_v30 = vpop.eup %3256  ;;  %v1131_v31 = vmul.f32 %v3255_v29, %v3249_v15  ;;  %v1421_v15 = vld [vmem:[#allocation8 + $0x190] sm:$0xff]  ;;  %v1403_v29 = vld [vmem:[#allocation8 + $0x100] sm:$0xff] }
 0x36a   : > { %v1129_v32 = vmul.f32 %v3257_v30, %v3247_v14  ;;  %v1420_v14 = vld [vmem:[#allocation8 + $0x188] sm:$0xff]  ;;  %1488 = vmatpush.msra.mxu2 %v1421_v15  ;;  %1452 = vmatpush.msra.mxu0 %v1403_v29  ;;  %v1588_v29 = vld [vmem:[#allocation11 + $0xd8] sm:$0xff] }
 0x36b   : > { %3024 = vmatmul.msk.f32.vlgmr.msra.gmra.mxu3 %vm1087_vm5, %v1131_v31  ;;  %v1404_v30 = vld [vmem:[#allocation8 + $0x108] sm:$0xff]  ;;  %v1405_v31 = vld [vmem:[#allocation8 + $0x110] sm:$0xff] }
 0x36c   : > { %3022 = vmatmul.msk.f32.vlgmr.msra.gmra.mxu1 %vm1087_vm5, %v1129_v32  ;;  %1505 = vmatpush.msra.mxu3 %v1434_v0  ;;  %v1406_v32 = vld [vmem:[#allocation8 + $0x118] sm:$0xff]  ;;  %v1373_v0 = vld [vmem:[#allocation8 + $0x10] sm:$0xff] }
 0x36d   : > { %1465 = vmatpush.msra.mxu1 %v1432_v62  ;;  %1489 = vmatpush.msra.mxu2 %v1417_v19  ;;  %v1371_v62 = vld [vmem:[#allocation8] sm:$0xff] }
 0x36e   : > { %1506 = vmatpush.msra.mxu3 %v1430_v4  ;;  %1453 = vmatpush.msra.mxu0 %v1399_v33  ;;  %v1575_v4 = vld [vmem:[#allocation11 + $0x70] sm:$0xff]  ;;  %v1606_v33 = vld [vmem:[#allocation11 + $0x168] sm:$0xff] }
 0x36f   : > { %1466 = vmatpush.msra.mxu1 %v1428_v2  ;;  %1490 = vmatpush.msra.mxu2 %v1413_v23  ;;  %v1576_v2 = vld [vmem:[#allocation11 + $0x78] sm:$0xff] }
 0x370   : > { %1507 = vmatpush.msra.mxu3 %v1426_v12  ;;  %1454 = vmatpush.msra.mxu0 %v1395_v37  ;;  %v1624_v12 = vld [vmem:[#allocation11 + $0x1f8] sm:$0xff]  ;;  %v1605_v37 = vld [vmem:[#allocation11 + $0x160] sm:$0xff] }
 0x371   : > { %1467 = vmatpush.msra.mxu1 %v1424_v10  ;;  %1491 = vmatpush.msra.mxu2 %v1409_v27  ;;  %v1608_v10 = vld [vmem:[#allocation11 + $0x178] sm:$0xff] }
 0x372   : > { %1508 = vmatpush.msra.mxu3 %v1422_v16  ;;  %1455 = vmatpush.msra.mxu0 %v1391_v41  ;;  %v1604_v41 = vld [vmem:[#allocation11 + $0x158] sm:$0xff] }
 0x373   : > { %1468 = vmatpush.msra.mxu1 %v1420_v14  ;;  %1492 = vmatpush.msra.mxu2 %v1405_v31  ;;  %v1589_v14 = vld [vmem:[#allocation11 + $0xe0] sm:$0xff]  ;;  %v1623_v31 = vld [vmem:[#allocation11 + $0x1f0] sm:$0xff] }
 0x374   : > { %1509 = vmatpush.msra.mxu3 %v1418_v20  ;;  %1456 = vmatpush.msra.mxu0 %v1387_v45  ;;  %v1603_v45 = vld [vmem:[#allocation11 + $0x150] sm:$0xff] }
 0x375   : > { %1469 = vmatpush.msra.mxu1 %v1416_v18  ;;  %1493 = vmatpush.msra.mxu2 %v1401_v35  ;;  %v1570_v35 = vld [vmem:[#allocation11 + $0x48] sm:$0xff] }
 0x376   : > { %1510 = vmatpush.msra.mxu3 %v1414_v24 }
 0x377   : > { %1470 = vmatpush.msra.mxu1 %v1412_v22  ;;  %1494 = vmatpush.msra.mxu2 %v1397_v39  ;;  %v3215_v22 = vld [vmem:[%s4161_s7] ss:$0 sm:$0xff]  ;;  %v1569_v39 = vld [vmem:[#allocation11 + $0x40] sm:$0xff] }
 0x378   : > { %1511 = vmatpush.msra.mxu3 %v1410_v28  ;;  %v1572_v28 = vld [vmem:[#allocation11 + $0x58] sm:$0xff] }
 0x379   : > { %1471 = vmatpush.msra.mxu1 %v1408_v26  ;;  %1495 = vmatpush.msra.mxu2 %v1393_v43  ;;  %v1568_v43 = vld [vmem:[#allocation11 + $0x38] sm:$0xff] }
 0x37a   : > { %1512 = vmatpush.msra.mxu3 %v1406_v32  ;;  %v1587_v32 = vld [vmem:[#allocation11 + $0xd0] sm:$0xff] }
 0x37b   : > { %1472 = vmatpush.msra.mxu1 %v1404_v30  ;;  %v1607_v30 = vld [vmem:[#allocation11 + $0x170] sm:$0xff] }
 0x37c   : > { %1513 = vmatpush.msra.mxu3 %v1402_v36  ;;  %v1586_v36 = vld [vmem:[#allocation11 + $0xc8] sm:$0xff] }
 0x37d   : > { %1473 = vmatpush.msra.mxu1 %v1400_v34  ;;  %v1622_v34 = vld [vmem:[#allocation11 + $0x1e8] sm:$0xff] }
 0x37e   : > { %1514 = vmatpush.msra.mxu3 %v1398_v40  ;;  %v1585_v40 = vld [vmem:[#allocation11 + $0xc0] sm:$0xff] }
 0x37f   : > { %1474 = vmatpush.msra.mxu1 %v1396_v38  ;;  %v1621_v38 = vld [vmem:[#allocation11 + $0x1e0] sm:$0xff] }
 0x380   : > { %1515 = vmatpush.msra.mxu3 %v1394_v44  ;;  %v1584_v44 = vld [vmem:[#allocation11 + $0xb8] sm:$0xff] }
 0x381   : > { %1475 = vmatpush.msra.mxu1 %v1392_v42  ;;  %v1620_v42 = vld [vmem:[#allocation11 + $0x1d8] sm:$0xff] }
 0x3d3   : > { %v1152_v46 = vpop.f32.mrf.mxu0 }
 0x3d4   : > { %3025 = vmatmul.msk.f32.vlgmr.msrb.gmra.mxu0 %vm982_vm4, %v1152_v46  ;;  %v1388_v46 = vld [vmem:[#allocation8 + $0x88] sm:$0xff] }
 0x3d5   : > { %1476 = vmatpush.msra.mxu1 %v1388_v46  ;;  %v1619_v46 = vld [vmem:[#allocation11 + $0x1d0] sm:$0xff] }
 0x3e6   : > { %v1198_v47 = vpop.f32.mrf.mxu2 }
 0x3e7   : > { %3027 = vmatmul.msk.f32.vlgmr.msrb.gmra.mxu2 %vm982_vm4, %v1198_v47  ;;  %v1389_v47 = vld [vmem:[#allocation8 + $0x90] sm:$0xff] }
 0x3e8   : > { %1496 = vmatpush.msra.mxu2 %v1389_v47  ;;  %v1567_v47 = vld [vmem:[#allocation11 + $0x30] sm:$0xff] }
 0x3e9   : > { %v1175_v48 = vpop.f32.mrf.mxu1 }
 0x3ea   : > { %3026 = vmatmul.msk.f32.vlgmr.msrb.gmra.mxu1 %vm982_vm4, %v1175_v48  ;;  %v1390_v48 = vld [vmem:[#allocation8 + $0x98] sm:$0xff] }
 0x3eb   : > { %1516 = vmatpush.msra.mxu3 %v1390_v48  ;;  %v1583_v48 = vld [vmem:[#allocation11 + $0xb0] sm:$0xff] }
 0x3ee   : > { %v1221_v49 = vpop.f32.mrf.mxu3 }
 0x3ef   : > { %3028 = vmatmul.msk.f32.vlgmr.msrb.gmra.mxu3 %vm982_vm4, %v1221_v49  ;;  %v1383_v49 = vld [vmem:[#allocation8 + $0x60] sm:$0xff] }
 0x3f0   : > { %1457 = vmatpush.msra.mxu0 %v1383_v49  ;;  %v1602_v49 = vld [vmem:[#allocation11 + $0x148] sm:$0xff] }
 0x451   : > { %v1260_v51 = vpop.f32.mrf.mxu0 }
 0x467   : > { %v1283_v50 = vpop.f32.mrf.mxu1 }
 0x468   : > { %v1332_v53 = vadd.f32 %v1283_v50, %v1260_v51  ;;  %v1384_v50 = vld [vmem:[#allocation8 + $0x68] sm:$0xff]  ;;  %v1385_v51 = vld [vmem:[#allocation8 + $0x70] sm:$0xff] }
 0x469   : > { %1477 = vmatpush.msra.mxu1 %v1384_v50  ;;  %1497 = vmatpush.msra.mxu2 %v1385_v51  ;;  %v1618_v50 = vld [vmem:[#allocation11 + $0x1c8] sm:$0xff] }
 0x46a   : > { %v1306_v52 = vpop.f32.mrf.mxu2  ;;  %v1566_v51 = vld [vmem:[#allocation11 + $0x28] sm:$0xff] }
 0x46b   : > { %v1333_v54 = vadd.f32 %v1332_v53, %v1306_v52  ;;  %v1386_v52 = vld [vmem:[#allocation8 + $0x78] sm:$0xff]  ;;  %v1379_v53 = vld [vmem:[#allocation8 + $0x40] sm:$0xff] }
 0x46c   : > { %1517 = vmatpush.msra.mxu3 %v1386_v52  ;;  %1458 = vmatpush.msra.mxu0 %v1379_v53  ;;  %v1582_v52 = vld [vmem:[#allocation11 + $0xa8] sm:$0xff]  ;;  %v1601_v53 = vld [vmem:[#allocation11 + $0x140] sm:$0xff] }
 0x472   : > { %v1329_v56 = vpop.f32.mrf.mxu3 }
 0x473   : > { %v1334_v57 = vadd.f32 %v1333_v54, %v1329_v56  ;;  %v1380_v54 = vld [vmem:[#allocation8 + $0x48] sm:$0xff]  ;;  %v1382_v56 = vld [vmem:[#allocation8 + $0x58] sm:$0xff] }
 0x474   : > { %1478 = vmatpush.msra.mxu1 %v1380_v54  ;;  %1518 = vmatpush.msra.mxu3 %v1382_v56  ;;  %v1617_v54 = vld [vmem:[#allocation11 + $0x1c0] sm:$0xff] }
 0x475   : > { %v1339_v59 = vadd.f32 %v3214_v55, %v1334_v57  ;;  %v1381_v55 = vld [vmem:[#allocation8 + $0x50] sm:$0xff]  ;;  %v1375_v57 = vld [vmem:[#allocation8 + $0x20] sm:$0xff]  ;;  %v1581_v56 = vld [vmem:[#allocation11 + $0xa0] sm:$0xff] }
 0x476   : > { %1498 = vmatpush.msra.mxu2 %v1381_v55  ;;  %1459 = vmatpush.msra.mxu0 %v1375_v57  ;;  %v1565_v55 = vld [vmem:[#allocation11 + $0x20] sm:$0xff]  ;;  %v1600_v57 = vld [vmem:[#allocation11 + $0x138] sm:$0xff] }
 0x477   : > { %v1340_v60 = vadd.f32 %v1339_v59, %v3815_v58  ;;  %v1376_v59 = vld [vmem:[#allocation8 + $0x28] sm:$0xff]  ;;  %1519 = vmatpush.msra.mxu3 %v1378_v61  ;;  %v1580_v61 = vld [vmem:[#allocation11 + $0x98] sm:$0xff] }
 0x478   : > { %1479 = vmatpush.msra.mxu1 %v1376_v59  ;;  %1460 = vmatpush.msra.mxu0 %v1371_v62  ;;  %v1616_v59 = vld [vmem:[#allocation11 + $0x1b8] sm:$0xff]  ;;  %v1599_v62 = vld [vmem:[#allocation11 + $0x130] sm:$0xff] }
 0x479   : > { %1343 = vadd.xlane.f32.xlu1 %v1340_v60  ;;  %1520 = vmatpush.msra.mxu3 %v1374_v1  ;;  %v1579_v1 = vld [vmem:[#allocation11 + $0x90] sm:$0xff] }
 0x47a   : > { %1480 = vmatpush.msra.mxu1 %v1372_v63  ;;  %1629 = vmatpush.msrb.mxu0 %v1576_v2  ;;  %v1615_v63 = vld [vmem:[#allocation11 + $0x1b0] sm:$0xff]  ;;  %v1598_v2 = vld [vmem:[#allocation11 + $0x128] sm:$0xff] }
 0x47b   : > { %1689 = vmatpush.msrb.mxu3 %v1624_v12  ;;  %v1612_v12 = vld [vmem:[#allocation11 + $0x198] sm:$0xff] }
 0x47c   : > { %1649 = vmatpush.msrb.mxu1 %v1592_v3  ;;  %1630 = vmatpush.msrb.mxu0 %v1575_v4  ;;  %v1614_v3 = vld [vmem:[#allocation11 + $0x1a8] sm:$0xff] }
 0x47d   : > { %1690 = vmatpush.msrb.mxu3 %v1623_v31  ;;  %v1562_v4 = vld [vmem:[#allocation11 + $0x8] sm:$0xff] }
 0x47f   : > { %1691 = vmatpush.msrb.mxu3 %v1622_v34 }
 0x481   : > { %1692 = vmatpush.msrb.mxu3 %v1621_v38 }
 0x483   : > { %1693 = vmatpush.msrb.mxu3 %v1620_v42 }
 0x485   : > { %1694 = vmatpush.msrb.mxu3 %v1619_v46 }
 0x487   : > { %1695 = vmatpush.msrb.mxu3 %v1618_v50 }
 0x489   : > { %1696 = vmatpush.msrb.mxu3 %v1617_v54 }
 0x48b   : > { %1697 = vmatpush.msrb.mxu3 %v1616_v59 }
 0x48d   : > { %1698 = vmatpush.msrb.mxu3 %v1615_v63 }
 0x48f   : > { %1699 = vmatpush.msrb.mxu3 %v1614_v3 }
 0x4ec   : > { %v1344_v5 = vpop.xlane.xlu1 %1343 }
 0x4ed   : > { %v1345_v58 = vmul.f32 %v1344_v5, %v3803_v7  ;;  %v1591_v5 = vld [vmem:[#allocation11 + $0xf0] sm:$0xff] }
 0x4ee   : > { %1650 = vmatpush.msrb.mxu1 %v1591_v5  ;;  %v1578_v5 = vld [vmem:[#allocation11 + $0x88] sm:$0xff] }
 0x4ef   : > { %v3942_v6 = vsub.f32 %v1340_v60, %v1345_v58  ;;  %v1377_v60 = vld [vmem:[#allocation8 + $0x30] sm:$0xff] }
 0x4f0   : > { %1499 = vmatpush.msra.mxu2 %v1377_v60  ;;  %1651 = vmatpush.msrb.mxu1 %v1590_v9  ;;  %v1564_v60 = vld [vmem:[#allocation11 + $0x18] sm:$0xff]  ;;  %v1561_v9 = vld [vmem:[#allocation11] sm:$0xff] }
 0x4f1   : > { %v1347_v8 = vmul.f32 %v3942_v6, %v3942_v6 }
 0x4f2   : > { %1500 = vmatpush.msra.mxu2 %v1373_v0  ;;  %1652 = vmatpush.msrb.mxu1 %v1589_v14  ;;  %v1563_v0 = vld [vmem:[#allocation11 + $0x10] sm:$0xff] }
 0x4f3   : > { %1348 = vadd.xlane.f32.xlu2 %v1347_v8  ;;  %v1574_v8 = vld [vmem:[#allocation11 + $0x68] sm:$0xff]  ;;  %v1611_v14 = vld [vmem:[#allocation11 + $0x190] sm:$0xff] }
 0x4f4   : > { %1669 = vmatpush.msrb.mxu2 %v1608_v10  ;;  %1631 = vmatpush.msrb.mxu0 %v1574_v8  ;;  %v1613_v8 = vld [vmem:[#allocation11 + $0x1a0] sm:$0xff] }
 0x4f5   : > { %1653 = vmatpush.msrb.mxu1 %v1588_v29  ;;  %v1577_v10 = vld [vmem:[#allocation11 + $0x80] sm:$0xff]  ;;  %1700 = vmatpush.msrb.mxu3 %v1613_v8 }
 0x4f6   : > { %1632 = vmatpush.msrb.mxu0 %v1573_v13  ;;  %1670 = vmatpush.msrb.mxu2 %v1607_v30  ;;  %v1595_v13 = vld [vmem:[#allocation11 + $0x110] sm:$0xff] }
 0x4f7   : > { %1654 = vmatpush.msrb.mxu1 %v1587_v32  ;;  %1701 = vmatpush.msrb.mxu3 %v1612_v12 }
 0x4f8   : > { %1633 = vmatpush.msrb.mxu0 %v1572_v28  ;;  %1671 = vmatpush.msrb.mxu2 %v1606_v33 }
 0x4f9   : > { %1655 = vmatpush.msrb.mxu1 %v1586_v36  ;;  %1702 = vmatpush.msrb.mxu3 %v1611_v14 }
 0x4fa   : > { %1672 = vmatpush.msrb.mxu2 %v1605_v37 }
 0x4fb   : > { %1656 = vmatpush.msrb.mxu1 %v1585_v40 }
 0x4fc   : > { %1673 = vmatpush.msrb.mxu2 %v1604_v41 }
 0x4fd   : > { %1657 = vmatpush.msrb.mxu1 %v1584_v44 }
 0x4fe   : > { %1674 = vmatpush.msrb.mxu2 %v1603_v45 }
 0x4ff   : > { %1658 = vmatpush.msrb.mxu1 %v1583_v48 }
 0x500   : > { %1675 = vmatpush.msrb.mxu2 %v1602_v49 }
 0x501   : > { %1659 = vmatpush.msrb.mxu1 %v1582_v52 }
 0x502   : > { %1676 = vmatpush.msrb.mxu2 %v1601_v53 }
 0x503   : > { %1660 = vmatpush.msrb.mxu1 %v1581_v56 }
 0x504   : > { %1677 = vmatpush.msrb.mxu2 %v1600_v57 }
 0x505   : > { %1661 = vmatpush.msrb.mxu1 %v1580_v61 }
 0x506   : > { %1678 = vmatpush.msrb.mxu2 %v1599_v62 }
 0x507   : > { %1662 = vmatpush.msrb.mxu1 %v1579_v1 }
 0x508   : > { %1679 = vmatpush.msrb.mxu2 %v1598_v2 }
 0x509   : > { %1663 = vmatpush.msrb.mxu1 %v1578_v5  ;;  %v3217_v5 = vld [vmem:[#allocation13] ss:$0 sm:$0xff] }
 0x50b   : > { %1664 = vmatpush.msrb.mxu1 %v1577_v10 }
 0x566   : > { %v1349_v58 = vpop.xlane.xlu2 %1348 }
 0x567   : > { %v1350_v11 = vmul.f32 %v1349_v58, %v3803_v7  ;;  %v1597_v58 = vld [vmem:[#allocation11 + $0x120] sm:$0xff] }
 0x568   : > { %1680 = vmatpush.msrb.mxu2 %v1597_v58 }
 0x569   : > { %v1351_v15 = vadd.f32 1e-05, %v1350_v11  ;;  %v1596_v11 = vld [vmem:[#allocation11 + $0x118] sm:$0xff] }
 0x56a   : > { %1681 = vmatpush.msrb.mxu2 %v1596_v11 }
 0x56b   : > { %3258 = vrsqrt.f32 %v1351_v15  ;;  %vm1358_vm7 = vweird.f32 %v1351_v15 }
 0x56c   : > { %1682 = vmatpush.msrb.mxu2 %v1595_v13 }
 0x571   : > { %v3259_v16 = vpop.eup %3258 }
 0x572   : > { %v1353_v17 = vmul.f32 %v3259_v16, %v1351_v15  ;;  %vm1359_vm6 = vweird.f32 %v3259_v16  ;;  %v1435_v15 = vld [vmem:[#allocation10] sm:$0xf] }
 0x573   : > { %vm1360_vm8 = vmor %vm1358_vm7, %vm1359_vm6  ;;  %v1439_v29 = vperm.slane %v1435_v15, 2  ;;  %v1440_v30 = vperm.slane %v1435_v15, 3 }
 0x574   : > { %v1354_v18 = vmul.f32 %v3259_v16, %v1353_v17  ;;  %v1610_v17 = vld [vmem:[#allocation11 + $0x188] sm:$0xff] }
 0x575   : > { %1703 = vmatpush.msrb.mxu3 %v1610_v17 }
 0x576   : > { %v1355_v19 = vmul.f32 0.5, %v1354_v18  ;;  %v1593_v18 = vld [vmem:[#allocation11 + $0x100] sm:$0xff] }
 0x578   : > { %v1356_v20 = vsub.f32 1.5, %v1355_v19  ;;  %v1609_v19 = vld [vmem:[#allocation11 + $0x180] sm:$0xff] }
 0x579   : > { %1704 = vmatpush.msrb.mxu3 %v1609_v19 }
 0x57a   : > { %v1357_v21 = vmul.f32 %v3259_v16, %v1356_v20  ;;  %v1437_v20 = vperm.slane %v1435_v15, 0 }
 0x57c   : > { %v1361_v23 = vsel %vm1360_vm8, %v3259_v16, %v1357_v21  ;;  %v1594_v16 = vld [vmem:[#allocation11 + $0x108] sm:$0xff]  ;;  %v1438_v21 = vperm.slane %v1435_v15, 1 }
 0x57d   : > { %v1362_v24 = vmul.f32 %v1361_v23, %v3942_v6  ;;  %v1571_v6 = vld [vmem:[#allocation11 + $0x50] sm:$0xff]  ;;  %1683 = vmatpush.msrb.mxu2 %v1594_v16 }
 0x57e   : > { %1634 = vmatpush.msrb.mxu0 %v1571_v6 }
 0x57f   : > { %v1366_v26 = vmul.f32 %v3215_v22, %v1362_v24  ;;  %1684 = vmatpush.msrb.mxu2 %v1593_v18 }
 0x580   : > { %1635 = vmatpush.msrb.mxu0 %v1570_v35 }
 0x581   : > { %v3951_v27 = vadd.f32 %v3216_v25, %v1366_v26 }
 0x582   : > { %1636 = vmatpush.msrb.mxu0 %v1569_v39 }
 0x583   : > { %1461 = vmatmul.f32.vlgmr.msra.gmra.mxu0 %v3951_v27  ;;  %1481 = vmatmul.f32.vlgmr.msra.gmra.mxu1 %v3951_v27 }
 0x584   : > { %1501 = vmatmul.f32.vlgmr.msra.gmra.mxu2 %v3951_v27  ;;  %1521 = vmatmul.f32.vlgmr.msra.gmra.mxu3 %v3951_v27 }
 0x585   : > { %1637 = vmatpush.msrb.mxu0 %v1568_v43 }
 0x587   : > { %1638 = vmatpush.msrb.mxu0 %v1567_v47 }
 0x589   : > { %1639 = vmatpush.msrb.mxu0 %v1566_v51 }
 0x58b   : > { %1640 = vmatpush.msrb.mxu0 %v1565_v55 }
 0x58d   : > { %1641 = vmatpush.msrb.mxu0 %v1564_v60 }
 0x58f   : > { %1642 = vmatpush.msrb.mxu0 %v1563_v0 }
 0x591   : > { %1643 = vmatpush.msrb.mxu0 %v1562_v4 }
 0x593   : > { %1644 = vmatpush.msrb.mxu0 %v1561_v9 }
 0x600   : > { %v1462_v22 = vpop.f32.mrf.mxu0  ;;  %v1482_v23 = vpop.f32.mrf.mxu1 }
 0x601   : > { %v1463_v24 = vadd.f32 %v1462_v22, %v1437_v20  ;;  %v1483_v25 = vadd.f32 %v1482_v23, %v1438_v21  ;;  %v1744_v20 = vld [vmem:[#allocation5 + $0x198] sm:$0xff] }
 0x602   : > { %v1748_v21 = vld [vmem:[#allocation5 + $0x1b8] sm:$0xff]  ;;  %1850 = vmatpush.xpose.msra.mxu0 %v1744_v20 }
 0x603   : > { %v1529_v26 = vmul.f32 0.044715, %v1463_v24  ;;  %v1530_v28 = vmul.f32 0.044715, %v1483_v25  ;;  %v1525_v54 = vmul.f32 0.5, %v1463_v24  ;;  %v1526_v56 = vmul.f32 0.5, %v1483_v25  ;;  %1870 = vmatpush.xpose.msra.mxu1 %v1748_v21 }
 0x604   : > { %v1752_v22 = vld [vmem:[#allocation5 + $0x1d8] sm:$0xff] }
 0x605   : > { %v1533_v31 = vmul.f32 %v1529_v26, %v1463_v24  ;;  %v1534_v6 = vmul.f32 %v1530_v28, %v1483_v25  ;;  %v1756_v23 = vld [vmem:[#allocation5 + $0x1f8] sm:$0xff]  ;;  %1890 = vmatpush.xpose.msra.mxu2 %v1752_v22  ;;  %v1755_v26 = vld [vmem:[#allocation5 + $0x1f0] sm:$0xff]  ;;  %v1742_v28 = vld [vmem:[#allocation5 + $0x188] sm:$0xff] }
 0x606   : > { %1910 = vmatpush.xpose.msra.mxu3 %v1756_v23  ;;  %v3220_v22 = vld [vmem:[%s4158_s4 + $0xc] ss:$0 sm:$0xff]  ;;  %v3221_v23 = vld [vmem:[%s4158_s4 + $0xd] ss:$0 sm:$0xff] }
 0x607   : > { %v1537_v32 = vmul.f32 %v1533_v31, %v1463_v24  ;;  %v1538_v33 = vmul.f32 %v1534_v6, %v1483_v25  ;;  %v1502_v34 = vpop.f32.mrf.mxu2  ;;  %v1522_v35 = vpop.f32.mrf.mxu3  ;;  %v1754_v31 = vld [vmem:[#allocation5 + $0x1e8] sm:$0xff]  ;;  %v1741_v6 = vld [vmem:[#allocation5 + $0x180] sm:$0xff] }
 0x608   : > { %v1503_v36 = vadd.f32 %v1502_v34, %v1439_v29  ;;  %v1523_v37 = vadd.f32 %v1522_v35, %v1440_v30  ;;  %v1746_v29 = vld [vmem:[#allocation5 + $0x1a8] sm:$0xff]  ;;  %v1753_v34 = vld [vmem:[#allocation5 + $0x1e0] sm:$0xff]  ;;  %v1760_v35 = vld [vmem:[#allocation5 + $0x218] sm:$0xff] }
 0x609   : > { %v1541_v38 = vadd.f32 %v1537_v32, %v1463_v24  ;;  %v1542_v39 = vadd.f32 %v1538_v33, %v1483_v25  ;;  %v1743_v24 = vld [vmem:[#allocation5 + $0x190] sm:$0xff]  ;;  %v1750_v30 = vld [vmem:[#allocation5 + $0x1c8] sm:$0xff]  ;;  %v1745_v32 = vld [vmem:[#allocation5 + $0x1a0] sm:$0xff] }
 0x60a   : > { %v1531_v40 = vmul.f32 0.044715, %v1503_v36  ;;  %v1532_v41 = vmul.f32 0.044715, %v1523_v37  ;;  %v1527_v63 = vmul.f32 0.5, %v1503_v36  ;;  %v1528_v1 = vmul.f32 0.5, %v1523_v37  ;;  %1851 = vmatpush.xpose.msra.mxu0 %v1743_v24  ;;  %1911 = vmatpush.xpose.msra.mxu3 %v1755_v26 }
 0x60b   : > { %v1545_v42 = vmul.f32 0.7978846, %v1541_v38  ;;  %v1546_v43 = vmul.f32 0.7978846, %v1542_v39  ;;  %v1751_v25 = vld [vmem:[#allocation5 + $0x1d0] sm:$0xff]  ;;  %v1749_v33 = vld [vmem:[#allocation5 + $0x1c0] sm:$0xff] }
 0x60c   : > { %v1535_v44 = vmul.f32 %v1531_v40, %v1503_v36  ;;  %v1536_v45 = vmul.f32 %v1532_v41, %v1523_v37  ;;  %1891 = vmatpush.xpose.msra.mxu2 %v1751_v25  ;;  %v1772_v38 = vld [vmem:[#allocation5 + $0x278] sm:$0xff]  ;;  %v1759_v39 = vld [vmem:[#allocation5 + $0x210] sm:$0xff]  ;;  %v3224_v24 = vld [vmem:[%s4158_s4 + $0x10] ss:$0 sm:$0xff] }
 0x60d   : > { %3260 = vtanh.f32 %v1545_v42  ;;  %v1763_v40 = vld [vmem:[#allocation5 + $0x230] sm:$0xff] }
 0x60e   : > { %v1539_v46 = vmul.f32 %v1535_v44, %v1503_v36  ;;  %v1540_v47 = vmul.f32 %v1536_v45, %v1523_v37  ;;  %3262 = vtanh.f32 %v1546_v43  ;;  %1852 = vmatpush.xpose.msra.mxu0 %v1742_v28  ;;  %1912 = vmatpush.xpose.msra.mxu3 %v1754_v31  ;;  %v1767_v41 = vld [vmem:[#allocation5 + $0x250] sm:$0xff]  ;;  %v1758_v43 = vld [vmem:[#allocation5 + $0x208] sm:$0xff] }
 0x60f   : > { %v1771_v42 = vld [vmem:[#allocation5 + $0x270] sm:$0xff]  ;;  %v1762_v44 = vld [vmem:[#allocation5 + $0x228] sm:$0xff] }
 0x610   : > { %v1543_v48 = vadd.f32 %v1539_v46, %v1503_v36  ;;  %v1544_v49 = vadd.f32 %v1540_v47, %v1523_v37  ;;  %1892 = vmatpush.xpose.msra.mxu2 %v1750_v30  ;;  %v1764_v36 = vld [vmem:[#allocation5 + $0x238] sm:$0xff]  ;;  %v1766_v45 = vld [vmem:[#allocation5 + $0x248] sm:$0xff]  ;;  %v1757_v47 = vld [vmem:[#allocation5 + $0x200] sm:$0xff] }
 0x611   : > { %v1768_v37 = vld [vmem:[#allocation5 + $0x258] sm:$0xff]  ;;  %v1770_v46 = vld [vmem:[#allocation5 + $0x268] sm:$0xff] }
 0x612   : > { %v1547_v50 = vmul.f32 0.7978846, %v1543_v48  ;;  %v1548_v51 = vmul.f32 0.7978846, %v1544_v49  ;;  %1853 = vmatpush.xpose.msra.mxu0 %v1741_v6  ;;  %1913 = vmatpush.xpose.msra.mxu3 %v1753_v34  ;;  %v1761_v48 = vld [vmem:[#allocation5 + $0x220] sm:$0xff] }
 0x613   : > { %v3261_v52 = vpop.eup %3260  ;;  %v1765_v49 = vld [vmem:[#allocation5 + $0x240] sm:$0xff]  ;;  %v3223_v34 = vld [vmem:[%s4158_s4 + $0xf] ss:$0 sm:$0xff] }
 0x614   : > { %v3263_v53 = vpop.eup %3262  ;;  %v1553_v55 = vadd.f32 1.0, %v3261_v52  ;;  %3264 = vtanh.f32 %v1547_v50  ;;  %1893 = vmatpush.xpose.msra.mxu2 %v1749_v33  ;;  %v1769_v50 = vld [vmem:[#allocation5 + $0x260] sm:$0xff]  ;;  %v3222_v33 = vld [vmem:[%s4158_s4 + $0xe] ss:$0 sm:$0xff] }
 0x615   : > { %v1554_v57 = vadd.f32 1.0, %v3263_v53  ;;  %3266 = vtanh.f32 %v1548_v51 }
 0x616   : > { %v1557_v59 = vmul.f32 %v1553_v55, %v1525_v54 }
 0x617   : > { %v1558_v60 = vmul.f32 %v1554_v57, %v1526_v56 }
 0x618   : > { %1645 = vmatmul.f32.vlgmr.msrb.gmra.mxu0 %v1557_v59 }
 0x619   : > { %1665 = vmatmul.f32.vlgmr.msrb.gmra.mxu1 %v1558_v60  ;;  %1930 = vmatpush.xpose.msrb.mxu0 %v1760_v35  ;;  %v3226_v35 = vld [vmem:[%s4158_s4 + $0x12] ss:$0 sm:$0xff] }
 0x61a   : > { %v3265_v61 = vpop.eup %3264 }
 0x61b   : > { %v3267_v62 = vpop.eup %3266  ;;  %v1555_v0 = vadd.f32 1.0, %v3265_v61  ;;  %v3218_v61 = vld [vmem:[%s4201_s25] ss:$0 sm:$0xff] }
 0x61c   : > { %v1556_v2 = vadd.f32 1.0, %v3267_v62 }
 0x61d   : > { %v1559_v3 = vmul.f32 %v1555_v0, %v1527_v63  ;;  %1931 = vmatpush.xpose.msrb.mxu0 %v1759_v39  ;;  %v3219_v63 = vld [vmem:[%s4202_s23] ss:$0 sm:$0xff]  ;;  %v3228_v39 = vld [vmem:[%s4158_s4 + $0x14] ss:$0 sm:$0xff] }
 0x61e   : > { %v1560_v4 = vmul.f32 %v1556_v2, %v1528_v1 }
 0x61f   : > { %1685 = vmatmul.f32.vlgmr.msrb.gmra.mxu2 %v1559_v3  ;;  %v1776_v3 = vld [vmem:[#allocation5 + $0x298] sm:$0xff] }
 0x620   : > { %1705 = vmatmul.f32.vlgmr.msrb.gmra.mxu3 %v1560_v4  ;;  %1970 = vmatpush.xpose.msrb.mxu2 %v1768_v37  ;;  %v1780_v4 = vld [vmem:[#allocation5 + $0x2b8] sm:$0xff] }
 0x621   : > { %1990 = vmatpush.xpose.msrb.mxu3 %v1772_v38  ;;  %1932 = vmatpush.xpose.msrb.mxu0 %v1758_v43  ;;  %v3227_v38 = vld [vmem:[%s4158_s4 + $0x13] ss:$0 sm:$0xff] }
 0x624   : > { %1971 = vmatpush.xpose.msrb.mxu2 %v1767_v41 }
 0x625   : > { %1991 = vmatpush.xpose.msrb.mxu3 %v1771_v42  ;;  %1933 = vmatpush.xpose.msrb.mxu0 %v1757_v47 }
 0x628   : > { %1972 = vmatpush.xpose.msrb.mxu2 %v1766_v45 }
 0x629   : > { %1992 = vmatpush.xpose.msrb.mxu3 %v1770_v46 }
 0x62c   : > { %1973 = vmatpush.xpose.msrb.mxu2 %v1765_v49 }
 0x62d   : > { %1993 = vmatpush.xpose.msrb.mxu3 %v1769_v50 }
 0x695   : > { %v1646_v58 = vpop.f32.mrf.mxu0 }
 0x696   : > { %v1647_v8 = vadd.f32 %v3217_v5, %v1646_v58  ;;  %v1666_v9 = vpop.f32.mrf.mxu1  ;;  %v1784_v5 = vld [vmem:[#allocation5 + $0x2d8] sm:$0xff] }
 0x697   : > { %v1788_v58 = vld [vmem:[#allocation5 + $0x2f8] sm:$0xff] }
 0x698   : > { %v1667_v10 = vadd.f32 %v1666_v9, %v1647_v8  ;;  %v1775_v8 = vld [vmem:[#allocation5 + $0x290] sm:$0xff] }
 0x699   : > { %v1779_v9 = vld [vmem:[#allocation5 + $0x2b0] sm:$0xff] }
 0x6a2   : > { %v1686_v11 = vpop.f32.mrf.mxu2 }
 0x6a3   : > { %v1687_v12 = vadd.f32 %v1686_v11, %v1667_v10  ;;  %v1706_v13 = vpop.f32.mrf.mxu3  ;;  %v1783_v10 = vld [vmem:[#allocation5 + $0x2d0] sm:$0xff] }
 0x6a4   : > { %v1787_v11 = vld [vmem:[#allocation5 + $0x2f0] sm:$0xff] }
 0x6a5   : > { %v1707_v14 = vadd.f32 %v1706_v13, %v1687_v12  ;;  %v1774_v12 = vld [vmem:[#allocation5 + $0x288] sm:$0xff] }
 0x6a6   : > { %v1778_v13 = vld [vmem:[#allocation5 + $0x2a8] sm:$0xff] }
 0x6a7   : > { %v1709_v15 = vadd.f32 %v1707_v14, %v3951_v27  ;;  %v1747_v27 = vld [vmem:[#allocation5 + $0x1b0] sm:$0xff]  ;;  %v1782_v14 = vld [vmem:[#allocation5 + $0x2c8] sm:$0xff] }
 0x6a8   : > { %1871 = vmatpush.xpose.msra.mxu1 %v1747_v27  ;;  %v3225_v27 = vld [vmem:[%s4158_s4 + $0x11] ss:$0 sm:$0xff] }
 0x6a9   : > { %1712 = vadd.xlane.f32.xlu0 %v1709_v15 }
 0x6ac   : > { %1872 = vmatpush.xpose.msra.mxu1 %v1746_v29 }
 0x6b0   : > { %1873 = vmatpush.xpose.msra.mxu1 %v1745_v32 }
 0x6b4   : > { %1950 = vmatpush.xpose.msrb.mxu1 %v1764_v36 }
 0x6b8   : > { %1951 = vmatpush.xpose.msrb.mxu1 %v1763_v40  ;;  %v3229_v40 = vld [vmem:[%s4158_s4 + $0x15] ss:$0 sm:$0xff] }
 0x6bc   : > { %1952 = vmatpush.xpose.msrb.mxu1 %v1762_v44 }
 0x6c0   : > { %1953 = vmatpush.xpose.msrb.mxu1 %v1761_v48 }
 0x71c   : > { %v1713_v16 = vpop.xlane.xlu0 %1712 }
 0x71d   : > { %v1714_v17 = vmul.f32 %v1713_v16, %v3803_v7  ;;  %v1773_v16 = vld [vmem:[#allocation5 + $0x280] sm:$0xff] }
 0x71f   : > { %v3959_v18 = vsub.f32 %v1709_v15, %v1714_v17  ;;  %v1786_v15 = vld [vmem:[#allocation5 + $0x2e8] sm:$0xff]  ;;  %v1777_v17 = vld [vmem:[#allocation5 + $0x2a0] sm:$0xff] }
 0x721   : > { %v1716_v19 = vmul.f32 %v3959_v18, %v3959_v18 }
 0x723   : > { %1717 = vadd.xlane.f32.xlu1 %v1716_v19  ;;  %v1785_v19 = vld [vmem:[#allocation5 + $0x2e0] sm:$0xff] }
 0x796   : > { %v1718_v51 = vpop.xlane.xlu1 %1717 }
 0x797   : > { %v1719_v52 = vmul.f32 %v1718_v51, %v3803_v7 }
 0x799   : > { %v1720_v53 = vadd.f32 1e-05, %v1719_v52 }
 0x79b   : > { %3268 = vrsqrt.f32 %v1720_v53  ;;  %vm1727_vm10 = vweird.f32 %v1720_v53 }
 0x7a1   : > { %v3269_v54 = vpop.eup %3268 }
 0x7a2   : > { %v1722_v55 = vmul.f32 %v3269_v54, %v1720_v53  ;;  %vm1728_vm9 = vweird.f32 %v3269_v54  ;;  %v3230_v53 = vld [vmem:[%s4158_s4 + $0x16] ss:$0 sm:$0xff] }
 0x7a3   : > { %vm1729_vm11 = vmor %vm1727_vm10, %vm1728_vm9 }
 0x7a4   : > { %v1723_v56 = vmul.f32 %v3269_v54, %v1722_v55 }
 0x7a6   : > { %v1724_v57 = vmul.f32 0.5, %v1723_v56 }
 0x7a8   : > { %v1725_v59 = vsub.f32 1.5, %v1724_v57 }
 0x7aa   : > { %v1726_v60 = vmul.f32 %v3269_v54, %v1725_v59 }
 0x7ac   : > { %v1730_v62 = vsel %vm1729_vm11, %v3269_v54, %v1726_v60  ;;  %v3231_v54 = vld [vmem:[%s4158_s4 + $0x17] ss:$0 sm:$0xff] }
 0x7ad   : > { %v1731_v0 = vmul.f32 %v1730_v62, %v3959_v18  ;;  %v1781_v18 = vld [vmem:[#allocation5 + $0x2c0] sm:$0xff] }
 0x7af   : > { %v1735_v1 = vmul.f32 %v3218_v61, %v1731_v0 }
 0x7b1   : > { %v3971_v2 = vadd.f32 %v3219_v63, %v1735_v1 }
 0x7b3   : > { %1854 = vmatmul.f32.vlgmr.msra.gmra.mxu0 %v3971_v2  ;;  %1874 = vmatmul.f32.vlgmr.msra.gmra.mxu1 %v3971_v2 }
 0x7b4   : > { %1894 = vmatmul.f32.vlgmr.msra.gmra.mxu2 %v3971_v2  ;;  %1914 = vmatmul.f32.vlgmr.msra.gmra.mxu3 %v3971_v2 }
 0x7b5   : > { %2010 = vmatpush.xpose.msra.mxu0 %v1776_v3  ;;  %2030 = vmatpush.xpose.msra.mxu1 %v1780_v4 }
 0x7b6   : > { %2050 = vmatpush.xpose.msra.mxu2 %v1784_v5  ;;  %2070 = vmatpush.xpose.msra.mxu3 %v1788_v58 }
 0x7b9   : > { %2011 = vmatpush.xpose.msra.mxu0 %v1775_v8  ;;  %2031 = vmatpush.xpose.msra.mxu1 %v1779_v9 }
 0x7ba   : > { %2051 = vmatpush.xpose.msra.mxu2 %v1783_v10  ;;  %2071 = vmatpush.xpose.msra.mxu3 %v1787_v11 }
 0x7bb   : > { %1934 = vmatmul.f32.vlgmr.msrb.gmra.mxu0 %v3971_v2  ;;  %1954 = vmatmul.f32.vlgmr.msrb.gmra.mxu1 %v3971_v2 }
 0x7bc   : > { %1974 = vmatmul.f32.vlgmr.msrb.gmra.mxu2 %v3971_v2  ;;  %1994 = vmatmul.f32.vlgmr.msrb.gmra.mxu3 %v3971_v2 }
 0x7bd   : > { %2012 = vmatpush.xpose.msra.mxu0 %v1774_v12  ;;  %2032 = vmatpush.xpose.msra.mxu1 %v1778_v13 }
 0x7be   : > { %2052 = vmatpush.xpose.msra.mxu2 %v1782_v14  ;;  %2072 = vmatpush.xpose.msra.mxu3 %v1786_v15 }
 0x7c1   : > { %2013 = vmatpush.xpose.msra.mxu0 %v1773_v16  ;;  %2033 = vmatpush.xpose.msra.mxu1 %v1777_v17 }
 0x7c2   : > { %2053 = vmatpush.xpose.msra.mxu2 %v1781_v18  ;;  %2073 = vmatpush.xpose.msra.mxu3 %v1785_v19 }
 0x7c4   : > { %2014 = vmatmul.f32.vlgmr.msra.gmra.mxu0 %v3971_v2  ;;  %2034 = vmatmul.f32.vlgmr.msra.gmra.mxu1 %v3971_v2 }
 0x7c5   : > { %2054 = vmatmul.f32.vlgmr.msra.gmra.mxu2 %v3971_v2  ;;  %2074 = vmatmul.f32.vlgmr.msra.gmra.mxu3 %v3971_v2 }
 0x830   : > { %v1855_v20 = vpop.f32.mrf.mxu0  ;;  %v1875_v21 = vpop.f32.mrf.mxu1 }
 0x831   : > { %v1856_v28 = vadd.f32 %v3220_v22, %v1855_v20  ;;  %v1876_v29 = vadd.f32 %v3221_v23, %v1875_v21 }
 0x833   : > { %v2078_v36 = vmul.f32 0.17677669, %v1856_v28  ;;  %v2079_v37 = vmul.f32 0.17677669, %v1876_v29  ;;  %v3055_v28 = vld [vmem:[%s4159_s5 + $0x90] sm:$0xff]  ;;  %v3054_v29 = vld [vmem:[%s4159_s5 + $0x88] sm:$0xff] }
 0x837   : > { %v1895_v25 = vpop.f32.mrf.mxu2  ;;  %v1915_v26 = vpop.f32.mrf.mxu3 }
 0x838   : > { %v1935_v30 = vpop.f32.mrf.mxu0  ;;  %v1955_v31 = vpop.f32.mrf.mxu1  ;;  %v1896_v41 = vadd.f32 %v3222_v33, %v1895_v25  ;;  %v1916_v42 = vadd.f32 %v3223_v34, %v1915_v26  ;;  %v3056_v26 = vld [vmem:[%s4159_s5 + $0x98] sm:$0xff] }
 0x839   : > { %v1936_v6 = vadd.f32 %v3224_v24, %v1935_v30  ;;  %v1956_v32 = vadd.f32 %v3225_v27, %v1955_v31 }
 0x83a   : > { %v2080_v51 = vmul.f32 0.17677669, %v1896_v41  ;;  %v2081_v52 = vmul.f32 0.17677669, %v1916_v42  ;;  %v3064_v41 = vld [vmem:[%s4159_s5 + $0xd8] sm:$0xff] }
 0x83b   : > { %3041 = vmatpush.xpose.msk.msrb.mxu0 %vm982_vm4, %v1936_v6  ;;  %3043 = vmatpush.xpose.msk.msrb.mxu1 %vm982_vm4, %v1956_v32  ;;  %v3068_v42 = vld [vmem:[%s4159_s5 + $0xf8] sm:$0xff] }
 0x83e   : > { %3042 = vmatmul.msk.f32.vlgmr.msrb.gmra.mxu0 %vm982_vm4, %v2078_v36  ;;  %3044 = vmatmul.msk.f32.vlgmr.msrb.gmra.mxu1 %vm982_vm4, %v2079_v37 }
 0x83f   : > { %v1975_v43 = vpop.f32.mrf.mxu2  ;;  %v1995_v44 = vpop.f32.mrf.mxu3 }
 0x840   : > { %v1976_v45 = vadd.f32 %v3226_v35, %v1975_v43  ;;  %v1996_v46 = vadd.f32 %v3227_v38, %v1995_v44  ;;  %v3060_v43 = vld [vmem:[%s4159_s5 + $0xb8] sm:$0xff]  ;;  %v3063_v44 = vld [vmem:[%s4159_s5 + $0xd0] sm:$0xff] }
 0x841   : > { %v2015_v47 = vpop.f32.mrf.mxu0  ;;  %v2035_v48 = vpop.f32.mrf.mxu1 }
 0x842   : > { %v2016_v49 = vadd.f32 %v3228_v39, %v2015_v47  ;;  %v2036_v50 = vadd.f32 %v3229_v40, %v2035_v48  ;;  %3045 = vmatpush.xpose.msk.msrb.mxu2 %vm982_vm4, %v1976_v45  ;;  %3047 = vmatpush.xpose.msk.msrb.mxu3 %vm982_vm4, %v1996_v46  ;;  %v3053_v40 = vld [vmem:[%s4159_s5 + $0x80] sm:$0xff]  ;;  %v3067_v45 = vld [vmem:[%s4159_s5 + $0xf0] sm:$0xff]  ;;  %v3062_v47 = vld [vmem:[%s4159_s5 + $0xc8] sm:$0xff] }
 0x843   : > { %v3059_v46 = vld [vmem:[%s4159_s5 + $0xb0] sm:$0xff]  ;;  %v3066_v48 = vld [vmem:[%s4159_s5 + $0xe8] sm:$0xff] }
 0x844   : > { %2248 = vmatpush.msra.mxu0 %v2016_v49  ;;  %2271 = vmatpush.msra.mxu1 %v2036_v50  ;;  %v3058_v49 = vld [vmem:[%s4159_s5 + $0xa8] sm:$0xff]  ;;  %v3061_v50 = vld [vmem:[%s4159_s5 + $0xc0] sm:$0xff] }
 0x845   : > { %3046 = vmatmul.msk.f32.vlgmr.msrb.gmra.mxu2 %vm982_vm4, %v2080_v51  ;;  %3048 = vmatmul.msk.f32.vlgmr.msrb.gmra.mxu3 %vm982_vm4, %v2081_v52  ;;  %v3065_v51 = vld [vmem:[%s4159_s5 + $0xe0] sm:$0xff] }
 0x846   : > { %2354 = vmatpush.msrb.mxu0 %v3056_v26  ;;  %2377 = vmatpush.msrb.mxu1 %v3060_v43  ;;  %v3057_v52 = vld [vmem:[%s4159_s5 + $0xa0] sm:$0xff]  ;;  %v2520_v26 = vld [vmem:[#allocation8 + $0x370] sm:$0xff] }
 0x847   : > { %v2505_v43 = vld [vmem:[#allocation8 + $0x2f8] sm:$0xff] }
 0x848   : > { %v2055_v55 = vpop.f32.mrf.mxu2  ;;  %v2075_v56 = vpop.f32.mrf.mxu3  ;;  %2355 = vmatpush.msrb.mxu0 %v3055_v28  ;;  %2378 = vmatpush.msrb.mxu1 %v3059_v46  ;;  %v2521_v28 = vld [vmem:[#allocation8 + $0x378] sm:$0xff]  ;;  %v2500_v46 = vld [vmem:[#allocation8 + $0x2d0] sm:$0xff] }
 0x849   : > { %v2056_v57 = vadd.f32 %v3230_v53, %v2055_v55  ;;  %v2076_v59 = vadd.f32 %v3231_v54, %v2075_v56 }
 0x84a   : > { %2356 = vmatpush.msrb.mxu0 %v3054_v29  ;;  %2379 = vmatpush.msrb.mxu1 %v3058_v49  ;;  %v2514_v29 = vld [vmem:[#allocation8 + $0x340] sm:$0xff]  ;;  %v2495_v49 = vld [vmem:[#allocation8 + $0x2a8] sm:$0xff] }
 0x84b   : > { %2294 = vmatpush.msra.mxu2 %v2056_v57  ;;  %2317 = vmatpush.msra.mxu3 %v2076_v59 }
 0x84c   : > { %2357 = vmatpush.msrb.mxu0 %v3053_v40  ;;  %2380 = vmatpush.msrb.mxu1 %v3057_v52  ;;  %v2502_v40 = vld [vmem:[#allocation8 + $0x2e0] sm:$0xff] }
 0x84d   : > { %2400 = vmatpush.msrb.mxu2 %v3064_v41  ;;  %2423 = vmatpush.msrb.mxu3 %v3068_v42  ;;  %v2503_v41 = vld [vmem:[#allocation8 + $0x2e8] sm:$0xff]  ;;  %v2504_v42 = vld [vmem:[#allocation8 + $0x2f0] sm:$0xff]  ;;  %v2490_v52 = vld [vmem:[#allocation8 + $0x280] sm:$0xff] }
 0x84f   : > { %2401 = vmatpush.msrb.mxu2 %v3063_v44  ;;  %2424 = vmatpush.msrb.mxu3 %v3067_v45  ;;  %v2498_v44 = vld [vmem:[#allocation8 + $0x2c0] sm:$0xff]  ;;  %v2499_v45 = vld [vmem:[#allocation8 + $0x2c8] sm:$0xff] }
 0x851   : > { %2402 = vmatpush.msrb.mxu2 %v3062_v47  ;;  %2425 = vmatpush.msrb.mxu3 %v3066_v48  ;;  %v2501_v47 = vld [vmem:[#allocation8 + $0x2d8] sm:$0xff]  ;;  %v2494_v48 = vld [vmem:[#allocation8 + $0x2a0] sm:$0xff] }
 0x853   : > { %2403 = vmatpush.msrb.mxu2 %v3061_v50  ;;  %2426 = vmatpush.msrb.mxu3 %v3065_v51  ;;  %v2496_v50 = vld [vmem:[#allocation8 + $0x2b0] sm:$0xff]  ;;  %v2497_v51 = vld [vmem:[#allocation8 + $0x2b8] sm:$0xff] }
 0x8bb   : > { %v2105_v60 = vpop.f32.mrf.mxu0  ;;  %v2131_v3 = vpop.f32.mrf.mxu1 }
 0x8bc   : > { %v2186_v61 = vsel %vm1087_vm5, %v2105_v60, -inf  ;;  %v2189_v4 = vsel %vm1087_vm5, %v2131_v3, -inf }
 0x8bd   : > { %2187 = vmax.xlane.f32.xlu1 %v2186_v61 }
 0x8c8   : > { %v2157_v62 = vpop.f32.mrf.mxu2  ;;  %v2183_v63 = vpop.f32.mrf.mxu3 }
 0x8c9   : > { %v2195_v0 = vsel %vm1087_vm5, %v2183_v63, -inf  ;;  %v2192_v1 = vsel %vm1087_vm5, %v2157_v62, -inf }
 0x8ca   : > { %2196 = vmax.xlane.f32.xlu0 %v2195_v0  ;;  %2193 = vmax.xlane.f32.xlu2 %v2192_v1 }
 0x8d2   : > { %2190 = vmax.xlane.f32.xlu2 %v2189_v4 }
 0x930   : > { %v2188_v5 = vpop.xlane.xlu1 %2187 }
 0x931   : > { %v2198_v58 = vsub.f32 %v2105_v60, %v2188_v5  ;;  %v2534_v5 = vld [vmem:[#allocation8 + $0x3e0] sm:$0xff] }
 0x933   : > { %v2202_v8 = vmul.f32 1.442695, %v2198_v58  ;;  %v2535_v58 = vld [vmem:[#allocation8 + $0x3e8] sm:$0xff] }
 0x935   : > { %3270 = vpow2.f32 %v2202_v8  ;;  %v2536_v8 = vld [vmem:[#allocation8 + $0x3f0] sm:$0xff] }
 0x93b   : > { %v3271_v9 = vpop.eup %3270 }
 0x93c   : > { %v2210_v10 = vsel %vm1087_vm5, %v3271_v9, 0.0 }
 0x93d   : > { %v2197_v11 = vpop.xlane.xlu0 %2196  ;;  %v2194_v12 = vpop.xlane.xlu2 %2193  ;;  %2211 = vadd.xlane.f32.xlu2 %v2210_v10  ;;  %v2530_v10 = vld [vmem:[#allocation8 + $0x3c0] sm:$0xff] }
 0x93e   : > { %v2201_v13 = vsub.f32 %v2183_v63, %v2197_v11  ;;  %v2200_v14 = vsub.f32 %v2157_v62, %v2194_v12  ;;  %v3232_v63 = vld [vmem:[%s4160_s6 + $0x1] ss:$0 sm:$0xff]  ;;  %v2531_v11 = vld [vmem:[#allocation8 + $0x3c8] sm:$0xff]  ;;  %v2532_v12 = vld [vmem:[#allocation8 + $0x3d0] sm:$0xff] }
 0x940   : > { %v2208_v15 = vmul.f32 1.442695, %v2201_v13  ;;  %v2206_v16 = vmul.f32 1.442695, %v2200_v14  ;;  %v2533_v13 = vld [vmem:[#allocation8 + $0x3d8] sm:$0xff] }
 0x942   : > { %3272 = vpow2.f32 %v2208_v15 }
 0x943   : > { %3274 = vpow2.f32 %v2206_v16 }
 0x945   : > { %v2191_v17 = vpop.xlane.xlu2 %2190 }
 0x946   : > { %v2199_v18 = vsub.f32 %v2131_v3, %v2191_v17  ;;  %v2526_v17 = vld [vmem:[#allocation8 + $0x3a0] sm:$0xff] }
 0x948   : > { %v3273_v19 = vpop.eup %3272  ;;  %v2204_v20 = vmul.f32 1.442695, %v2199_v18  ;;  %v2527_v18 = vld [vmem:[#allocation8 + $0x3a8] sm:$0xff] }
 0x949   : > { %v3275_v21 = vpop.eup %3274  ;;  %v2219_v22 = vsel %vm1087_vm5, %v3273_v19, 0.0 }
 0x94a   : > { %3276 = vpow2.f32 %v2204_v20  ;;  %v2216_v23 = vsel %vm1087_vm5, %v3275_v21, 0.0  ;;  %2220 = vadd.xlane.f32.xlu1 %v2219_v22  ;;  %v2529_v20 = vld [vmem:[#allocation8 + $0x3b8] sm:$0xff]  ;;  %v2523_v22 = vld [vmem:[#allocation8 + $0x388] sm:$0xff] }
 0x94b   : > { %2217 = vadd.xlane.f32.xlu0 %v2216_v23  ;;  %v2524_v23 = vld [vmem:[#allocation8 + $0x390] sm:$0xff] }
 0x950   : > { %v3277_v24 = vpop.eup %3276 }
 0x951   : > { %v2213_v27 = vsel %vm1087_vm5, %v3277_v24, 0.0 }
 0x953   : > { %2214 = vadd.xlane.f32.xlu0 %v2213_v27  ;;  %v2518_v27 = vld [vmem:[#allocation8 + $0x360] sm:$0xff] }
 0x9b0   : > { %v2212_v25 = vpop.xlane.xlu2 %2211 }
 0x9b1   : > { %3278 = vrcp.f32 %v2212_v25  ;;  %v2519_v25 = vld [vmem:[#allocation8 + $0x368] sm:$0xff] }
 0x9b7   : > { %v3279_v30 = vpop.eup %3278 }
 0x9b8   : > { %v2226_v31 = vmul.f32 %v3279_v30, %v3271_v9  ;;  %v2537_v9 = vld [vmem:[#allocation8 + $0x3f8] sm:$0xff]  ;;  %v2515_v30 = vld [vmem:[#allocation8 + $0x348] sm:$0xff] }
 0x9ba   : > { %3049 = vmatmul.msk.f32.vlgmr.msra.gmra.mxu0 %vm1087_vm5, %v2226_v31  ;;  %v2516_v31 = vld [vmem:[#allocation8 + $0x350] sm:$0xff] }
 0x9bb   : > { %2549 = vmatpush.msra.mxu0 %v2534_v5  ;;  %v2481_v5 = vld [vmem:[#allocation8 + $0x238] sm:$0xff] }
 0x9bd   : > { %v2221_v6 = vpop.xlane.xlu1 %2220  ;;  %2550 = vmatpush.msra.mxu0 %v2530_v10  ;;  %v2477_v10 = vld [vmem:[#allocation8 + $0x218] sm:$0xff] }
 0x9be   : > { %v2218_v32 = vpop.xlane.xlu0 %2217  ;;  %3280 = vrcp.f32 %v2221_v6  ;;  %v2517_v6 = vld [vmem:[#allocation8 + $0x358] sm:$0xff] }
 0x9bf   : > { %3282 = vrcp.f32 %v2218_v32  ;;  %2551 = vmatpush.msra.mxu0 %v2526_v17  ;;  %v2510_v32 = vld [vmem:[#allocation8 + $0x320] sm:$0xff]  ;;  %v2695_v17 = vld [vmem:[#allocation11 + $0x2e8] sm:$0xff] }
 0x9c4   : > { %v3281_v33 = vpop.eup %3280 }
 0x9c5   : > { %v3283_v34 = vpop.eup %3282  ;;  %v2229_v35 = vmul.f32 %v3281_v33, %v3273_v19  ;;  %v2528_v19 = vld [vmem:[#allocation8 + $0x3b0] sm:$0xff]  ;;  %v2511_v33 = vld [vmem:[#allocation8 + $0x328] sm:$0xff] }
 0x9c6   : > { %v2228_v36 = vmul.f32 %v3283_v34, %v3275_v21  ;;  %v2215_v37 = vpop.xlane.xlu0 %2214  ;;  %v2522_v21 = vld [vmem:[#allocation8 + $0x380] sm:$0xff]  ;;  %v2512_v34 = vld [vmem:[#allocation8 + $0x330] sm:$0xff] }
 0x9c7   : > { %3284 = vrcp.f32 %v2215_v37  ;;  %3052 = vmatmul.msk.f32.vlgmr.msra.gmra.mxu3 %vm1087_vm5, %v2229_v35  ;;  %2552 = vmatpush.msra.mxu0 %v2522_v21  ;;  %v2513_v35 = vld [vmem:[#allocation8 + $0x338] sm:$0xff]  ;;  %v2507_v37 = vld [vmem:[#allocation8 + $0x308] sm:$0xff] }
 0x9c8   : > { %3051 = vmatmul.msk.f32.vlgmr.msra.gmra.mxu2 %vm1087_vm5, %v2228_v36  ;;  %2609 = vmatpush.msra.mxu3 %v2537_v9  ;;  %v2506_v36 = vld [vmem:[#allocation8 + $0x300] sm:$0xff]  ;;  %v2476_v9 = vld [vmem:[#allocation8 + $0x210] sm:$0xff]  ;;  %v2678_v21 = vld [vmem:[#allocation11 + $0x260] sm:$0xff] }
 0x9c9   : > { %2589 = vmatpush.msra.mxu2 %v2536_v8  ;;  %2553 = vmatpush.msra.mxu0 %v2518_v27  ;;  %v2475_v8 = vld [vmem:[#allocation8 + $0x208] sm:$0xff] }
 0x9ca   : > { %2610 = vmatpush.msra.mxu3 %v2533_v13  ;;  %v2680_v13 = vld [vmem:[#allocation11 + $0x270] sm:$0xff] }
 0x9cb   : > { %2590 = vmatpush.msra.mxu2 %v2532_v12  ;;  %2554 = vmatpush.msra.mxu0 %v2514_v29  ;;  %v2697_v12 = vld [vmem:[#allocation11 + $0x2f8] sm:$0xff] }
 0x9cc   : > { %2611 = vmatpush.msra.mxu3 %v2529_v20  ;;  %v2729_v20 = vld [vmem:[#allocation11 + $0x3f8] sm:$0xff] }
 0x9cd   : > { %v3285_v38 = vpop.eup %3284  ;;  %2591 = vmatpush.msra.mxu2 %v2528_v19  ;;  %2555 = vmatpush.msra.mxu0 %v2510_v32  ;;  %v3234_v32 = vld [vmem:[#allocation7 + $0x1] ss:$0 sm:$0xff] }
 0x9ce   : > { %v2227_v39 = vmul.f32 %v3285_v38, %v3277_v24  ;;  %v2525_v24 = vld [vmem:[#allocation8 + $0x398] sm:$0xff]  ;;  %v2508_v38 = vld [vmem:[#allocation8 + $0x310] sm:$0xff] }
 0x9cf   : > { %2592 = vmatpush.msra.mxu2 %v2524_v23  ;;  %2612 = vmatpush.msra.mxu3 %v2525_v24 }
 0x9d0   : > { %3050 = vmatmul.msk.f32.vlgmr.msra.gmra.mxu1 %vm1087_vm5, %v2227_v39  ;;  %2556 = vmatpush.msra.mxu0 %v2506_v36  ;;  %v2509_v39 = vld [vmem:[#allocation8 + $0x318] sm:$0xff]  ;;  %v2693_v36 = vld [vmem:[#allocation11 + $0x2d8] sm:$0xff] }
 0x9d1   : > { %2569 = vmatpush.msra.mxu1 %v2535_v58  ;;  %2593 = vmatpush.msra.mxu2 %v2520_v26  ;;  %v2474_v58 = vld [vmem:[#allocation8 + $0x200] sm:$0xff] }
 0x9d2   : > { %2613 = vmatpush.msra.mxu3 %v2521_v28  ;;  %2557 = vmatpush.msra.mxu0 %v2502_v40  ;;  %v2711_v40 = vld [vmem:[#allocation11 + $0x368] sm:$0xff] }
 0x9d3   : > { %2570 = vmatpush.msra.mxu1 %v2531_v11  ;;  %2594 = vmatpush.msra.mxu2 %v2516_v31  ;;  %v2681_v11 = vld [vmem:[#allocation11 + $0x278] sm:$0xff] }
 0x9d4   : > { %2614 = vmatpush.msra.mxu3 %v2517_v6  ;;  %2558 = vmatpush.msra.mxu0 %v2498_v44  ;;  %v2710_v44 = vld [vmem:[#allocation11 + $0x360] sm:$0xff] }
 0x9d5   : > { %2571 = vmatpush.msra.mxu1 %v2527_v18  ;;  %2595 = vmatpush.msra.mxu2 %v2512_v34  ;;  %v2713_v18 = vld [vmem:[#allocation11 + $0x378] sm:$0xff] }
 0x9d6   : > { %2615 = vmatpush.msra.mxu3 %v2513_v35  ;;  %2559 = vmatpush.msra.mxu0 %v2494_v48  ;;  %v2677_v35 = vld [vmem:[#allocation11 + $0x258] sm:$0xff] }
 0x9d7   : > { %2572 = vmatpush.msra.mxu1 %v2523_v22  ;;  %2596 = vmatpush.msra.mxu2 %v2508_v38  ;;  %v2694_v22 = vld [vmem:[#allocation11 + $0x2e0] sm:$0xff]  ;;  %v2728_v38 = vld [vmem:[#allocation11 + $0x3f0] sm:$0xff]  ;;  %v2709_v48 = vld [vmem:[#allocation11 + $0x358] sm:$0xff] }
 0x9d8   : > { %2616 = vmatpush.msra.mxu3 %v2509_v39  ;;  %2560 = vmatpush.msra.mxu0 %v2490_v52  ;;  %v2692_v39 = vld [vmem:[#allocation11 + $0x2d0] sm:$0xff] }
 0x9d9   : > { %2573 = vmatpush.msra.mxu1 %v2519_v25  ;;  %2597 = vmatpush.msra.mxu2 %v2504_v42  ;;  %v2675_v42 = vld [vmem:[#allocation11 + $0x248] sm:$0xff]  ;;  %v2708_v52 = vld [vmem:[#allocation11 + $0x350] sm:$0xff] }
 0x9da   : > { %2617 = vmatpush.msra.mxu3 %v2505_v43  ;;  %v2691_v43 = vld [vmem:[#allocation11 + $0x2c8] sm:$0xff] }
 0x9db   : > { %2574 = vmatpush.msra.mxu1 %v2515_v30  ;;  %2598 = vmatpush.msra.mxu2 %v2500_v46  ;;  %v3233_v30 = vld [vmem:[%s4161_s7 + $0x1] ss:$0 sm:$0xff]  ;;  %v2674_v46 = vld [vmem:[#allocation11 + $0x240] sm:$0xff] }
 0x9dc   : > { %2618 = vmatpush.msra.mxu3 %v2501_v47  ;;  %v2690_v47 = vld [vmem:[#allocation11 + $0x2c0] sm:$0xff] }
 0x9dd   : > { %2575 = vmatpush.msra.mxu1 %v2511_v33  ;;  %2599 = vmatpush.msra.mxu2 %v2496_v50  ;;  %v2673_v50 = vld [vmem:[#allocation11 + $0x238] sm:$0xff] }
 0x9de   : > { %2619 = vmatpush.msra.mxu3 %v2497_v51  ;;  %v2689_v51 = vld [vmem:[#allocation11 + $0x2b8] sm:$0xff] }
 0x9df   : > { %2576 = vmatpush.msra.mxu1 %v2507_v37  ;;  %v2712_v37 = vld [vmem:[#allocation11 + $0x370] sm:$0xff] }
 0x9e1   : > { %2577 = vmatpush.msra.mxu1 %v2503_v41  ;;  %v2727_v41 = vld [vmem:[#allocation11 + $0x3e8] sm:$0xff] }
 0x9e3   : > { %2578 = vmatpush.msra.mxu1 %v2499_v45  ;;  %v2726_v45 = vld [vmem:[#allocation11 + $0x3e0] sm:$0xff] }
 0x9e5   : > { %2579 = vmatpush.msra.mxu1 %v2495_v49  ;;  %v2725_v49 = vld [vmem:[#allocation11 + $0x3d8] sm:$0xff] }
 0xa37   : > { %v2250_v53 = vpop.f32.mrf.mxu0 }
 0xa38   : > { %3069 = vmatmul.msk.f32.vlgmr.msrb.gmra.mxu0 %vm982_vm4, %v2250_v53  ;;  %v2491_v53 = vld [vmem:[#allocation8 + $0x288] sm:$0xff] }
 0xa39   : > { %2580 = vmatpush.msra.mxu1 %v2491_v53  ;;  %v2724_v53 = vld [vmem:[#allocation11 + $0x3d0] sm:$0xff] }
 0xa4a   : > { %v2319_v54 = vpop.f32.mrf.mxu3 }
 0xa4b   : > { %v2296_v55 = vpop.f32.mrf.mxu2  ;;  %3072 = vmatmul.msk.f32.vlgmr.msrb.gmra.mxu3 %vm982_vm4, %v2319_v54  ;;  %v2492_v54 = vld [vmem:[#allocation8 + $0x290] sm:$0xff] }
 0xa4c   : > { %3071 = vmatmul.msk.f32.vlgmr.msrb.gmra.mxu2 %vm982_vm4, %v2296_v55  ;;  %v2493_v55 = vld [vmem:[#allocation8 + $0x298] sm:$0xff] }
 0xa4d   : > { %v2273_v56 = vpop.f32.mrf.mxu1  ;;  %2600 = vmatpush.msra.mxu2 %v2492_v54  ;;  %2620 = vmatpush.msra.mxu3 %v2493_v55  ;;  %v2672_v54 = vld [vmem:[#allocation11 + $0x230] sm:$0xff] }
 0xa4e   : > { %3070 = vmatmul.msk.f32.vlgmr.msrb.gmra.mxu1 %vm982_vm4, %v2273_v56  ;;  %v2486_v56 = vld [vmem:[#allocation8 + $0x260] sm:$0xff]  ;;  %v2688_v55 = vld [vmem:[#allocation11 + $0x2b0] sm:$0xff] }
 0xa4f   : > { %2561 = vmatpush.msra.mxu0 %v2486_v56  ;;  %v2707_v56 = vld [vmem:[#allocation11 + $0x348] sm:$0xff] }
 0xab5   : > { %v2359_v59 = vpop.f32.mrf.mxu0 }
 0xacb   : > { %v2382_v57 = vpop.f32.mrf.mxu1 }
 0xacc   : > { %v2431_v60 = vadd.f32 %v2382_v57, %v2359_v59  ;;  %v2487_v57 = vld [vmem:[#allocation8 + $0x268] sm:$0xff]  ;;  %v2488_v59 = vld [vmem:[#allocation8 + $0x270] sm:$0xff] }
 0xacd   : > { %2581 = vmatpush.msra.mxu1 %v2487_v57  ;;  %2601 = vmatpush.msra.mxu2 %v2488_v59  ;;  %v2723_v57 = vld [vmem:[#allocation11 + $0x3c8] sm:$0xff] }
 0xace   : > { %v2428_v0 = vpop.f32.mrf.mxu3  ;;  %v2671_v59 = vld [vmem:[#allocation11 + $0x228] sm:$0xff] }
 0xacf   : > { %v2405_v61 = vpop.f32.mrf.mxu2 }
 0xad0   : > { %v2432_v62 = vadd.f32 %v2431_v60, %v2405_v61  ;;  %v2489_v60 = vld [vmem:[#allocation8 + $0x278] sm:$0xff]  ;;  %v2482_v61 = vld [vmem:[#allocation8 + $0x240] sm:$0xff] }
 0xad1   : > { %2621 = vmatpush.msra.mxu3 %v2489_v60  ;;  %2562 = vmatpush.msra.mxu0 %v2482_v61  ;;  %v2687_v60 = vld [vmem:[#allocation11 + $0x2a8] sm:$0xff]  ;;  %v2706_v61 = vld [vmem:[#allocation11 + $0x340] sm:$0xff] }
 0xad2   : > { %v2433_v1 = vadd.f32 %v2432_v62, %v2428_v0  ;;  %v2483_v62 = vld [vmem:[#allocation8 + $0x248] sm:$0xff]  ;;  %v2485_v0 = vld [vmem:[#allocation8 + $0x258] sm:$0xff] }
 0xad3   : > { %2582 = vmatpush.msra.mxu1 %v2483_v62  ;;  %2622 = vmatpush.msra.mxu3 %v2485_v0  ;;  %v2722_v62 = vld [vmem:[#allocation11 + $0x3c0] sm:$0xff] }
 0xad4   : > { %v2439_v3 = vadd.f32 %v3232_v63, %v2433_v1  ;;  %v2484_v63 = vld [vmem:[#allocation8 + $0x250] sm:$0xff]  ;;  %v2478_v1 = vld [vmem:[#allocation8 + $0x220] sm:$0xff]  ;;  %v2686_v0 = vld [vmem:[#allocation11 + $0x2a0] sm:$0xff] }
 0xad5   : > { %2602 = vmatpush.msra.mxu2 %v2484_v63  ;;  %2563 = vmatpush.msra.mxu0 %v2478_v1  ;;  %v2670_v63 = vld [vmem:[#allocation11 + $0x220] sm:$0xff]  ;;  %v2705_v1 = vld [vmem:[#allocation11 + $0x338] sm:$0xff] }
 0xad6   : > { %v2440_v4 = vadd.f32 %v2439_v3, %v3971_v2  ;;  %v2479_v3 = vld [vmem:[#allocation8 + $0x228] sm:$0xff]  ;;  %2623 = vmatpush.msra.mxu3 %v2481_v5  ;;  %v2685_v5 = vld [vmem:[#allocation11 + $0x298] sm:$0xff] }
 0xad7   : > { %2583 = vmatpush.msra.mxu1 %v2479_v3  ;;  %2564 = vmatpush.msra.mxu0 %v2474_v58  ;;  %v2721_v3 = vld [vmem:[#allocation11 + $0x3b8] sm:$0xff]  ;;  %v2704_v58 = vld [vmem:[#allocation11 + $0x330] sm:$0xff] }
 0xad8   : > { %2445 = vadd.xlane.f32.xlu1 %v2440_v4  ;;  %2624 = vmatpush.msra.mxu3 %v2477_v10  ;;  %v2684_v10 = vld [vmem:[#allocation11 + $0x290] sm:$0xff] }
 0xad9   : > { %2584 = vmatpush.msra.mxu1 %v2475_v8  ;;  %2735 = vmatpush.msrb.mxu0 %v2681_v11  ;;  %v2720_v8 = vld [vmem:[#allocation11 + $0x3b0] sm:$0xff]  ;;  %v2703_v11 = vld [vmem:[#allocation11 + $0x328] sm:$0xff] }
 0xada   : > { %2795 = vmatpush.msrb.mxu3 %v2729_v20  ;;  %v2717_v20 = vld [vmem:[#allocation11 + $0x398] sm:$0xff] }
 0xadb   : > { %2755 = vmatpush.msrb.mxu1 %v2697_v12  ;;  %2736 = vmatpush.msrb.mxu0 %v2680_v13  ;;  %v2719_v12 = vld [vmem:[#allocation11 + $0x3a8] sm:$0xff] }
 0xadc   : > { %2796 = vmatpush.msrb.mxu3 %v2728_v38  ;;  %v2667_v13 = vld [vmem:[#allocation11 + $0x208] sm:$0xff] }
 0xade   : > { %2797 = vmatpush.msrb.mxu3 %v2727_v41 }
 0xae0   : > { %2798 = vmatpush.msrb.mxu3 %v2726_v45 }
 0xae2   : > { %2799 = vmatpush.msrb.mxu3 %v2725_v49 }
 0xae4   : > { %2800 = vmatpush.msrb.mxu3 %v2724_v53 }
 0xae6   : > { %2801 = vmatpush.msrb.mxu3 %v2723_v57 }
 0xae8   : > { %2802 = vmatpush.msrb.mxu3 %v2722_v62 }
 0xaea   : > { %2803 = vmatpush.msrb.mxu3 %v2721_v3 }
 0xaec   : > { %2804 = vmatpush.msrb.mxu3 %v2720_v8 }
 0xaee   : > { %2805 = vmatpush.msrb.mxu3 %v2719_v12 }
 0xb4b   : > { %v2446_v14 = vpop.xlane.xlu1 %2445 }
 0xb4c   : > { %v2447_v2 = vmul.f32 %v2446_v14, %v3803_v7  ;;  %v2696_v14 = vld [vmem:[#allocation11 + $0x2f0] sm:$0xff] }
 0xb4d   : > { %2756 = vmatpush.msrb.mxu1 %v2696_v14  ;;  %v2683_v14 = vld [vmem:[#allocation11 + $0x288] sm:$0xff] }
 0xb4e   : > { %v4098_v15 = vsub.f32 %v2440_v4, %v2447_v2  ;;  %v2480_v4 = vld [vmem:[#allocation8 + $0x230] sm:$0xff] }
 0xb4f   : > { %2603 = vmatpush.msra.mxu2 %v2480_v4  ;;  %2757 = vmatpush.msrb.mxu1 %v2695_v17  ;;  %v2669_v4 = vld [vmem:[#allocation11 + $0x218] sm:$0xff]  ;;  %v2666_v17 = vld [vmem:[#allocation11 + $0x200] sm:$0xff] }
 0xb50   : > { %v2449_v16 = vmul.f32 %v4098_v15, %v4098_v15 }
 0xb51   : > { %2604 = vmatpush.msra.mxu2 %v2476_v9  ;;  %2758 = vmatpush.msrb.mxu1 %v2694_v22  ;;  %v2668_v9 = vld [vmem:[#allocation11 + $0x210] sm:$0xff] }
 0xb52   : > { %2450 = vadd.xlane.f32.xlu2 %v2449_v16  ;;  %v2679_v16 = vld [vmem:[#allocation11 + $0x268] sm:$0xff]  ;;  %v2716_v22 = vld [vmem:[#allocation11 + $0x390] sm:$0xff] }
 0xb53   : > { %2775 = vmatpush.msrb.mxu2 %v2713_v18  ;;  %2737 = vmatpush.msrb.mxu0 %v2679_v16  ;;  %v2718_v16 = vld [vmem:[#allocation11 + $0x3a0] sm:$0xff] }
 0xb54   : > { %2759 = vmatpush.msrb.mxu1 %v2693_v36  ;;  %v2682_v18 = vld [vmem:[#allocation11 + $0x280] sm:$0xff]  ;;  %2806 = vmatpush.msrb.mxu3 %v2718_v16 }
 0xb55   : > { %2738 = vmatpush.msrb.mxu0 %v2678_v21  ;;  %2776 = vmatpush.msrb.mxu2 %v2712_v37  ;;  %v2700_v21 = vld [vmem:[#allocation11 + $0x310] sm:$0xff] }
 0xb56   : > { %2760 = vmatpush.msrb.mxu1 %v2692_v39  ;;  %2807 = vmatpush.msrb.mxu3 %v2717_v20 }
 0xb57   : > { %2739 = vmatpush.msrb.mxu0 %v2677_v35  ;;  %2777 = vmatpush.msrb.mxu2 %v2711_v40 }
 0xb58   : > { %2761 = vmatpush.msrb.mxu1 %v2691_v43  ;;  %2808 = vmatpush.msrb.mxu3 %v2716_v22 }
 0xb59   : > { %2778 = vmatpush.msrb.mxu2 %v2710_v44 }
 0xb5a   : > { %2762 = vmatpush.msrb.mxu1 %v2690_v47 }
 0xb5b   : > { %2779 = vmatpush.msrb.mxu2 %v2709_v48 }
 0xb5c   : > { %2763 = vmatpush.msrb.mxu1 %v2689_v51 }
 0xb5d   : > { %2780 = vmatpush.msrb.mxu2 %v2708_v52 }
 0xb5e   : > { %2764 = vmatpush.msrb.mxu1 %v2688_v55 }
 0xb5f   : > { %2781 = vmatpush.msrb.mxu2 %v2707_v56 }
 0xb60   : > { %2765 = vmatpush.msrb.mxu1 %v2687_v60 }
 0xb61   : > { %2782 = vmatpush.msrb.mxu2 %v2706_v61 }
 0xb62   : > { %2766 = vmatpush.msrb.mxu1 %v2686_v0 }
 0xb63   : > { %2783 = vmatpush.msrb.mxu2 %v2705_v1 }
 0xb64   : > { %2767 = vmatpush.msrb.mxu1 %v2685_v5 }
 0xb65   : > { %2784 = vmatpush.msrb.mxu2 %v2704_v58 }
 0xb66   : > { %2768 = vmatpush.msrb.mxu1 %v2684_v10 }
 0xb67   : > { %2785 = vmatpush.msrb.mxu2 %v2703_v11 }
 0xb68   : > { %2769 = vmatpush.msrb.mxu1 %v2683_v14  ;;  %v3235_v14 = vld [vmem:[#allocation13 + $0x1] ss:$0 sm:$0xff] }
 0xb6a   : > { %2770 = vmatpush.msrb.mxu1 %v2682_v18 }
 0xbc5   : > { %v2451_v2 = vpop.xlane.xlu2 %2450 }
 0xbc6   : > { %v2452_v19 = vmul.f32 %v2451_v2, %v3803_v7  ;;  %v2702_v2 = vld [vmem:[#allocation11 + $0x320] sm:$0xff] }
 0xbc7   : > { %2786 = vmatpush.msrb.mxu2 %v2702_v2 }
 0xbc8   : > { %v2453_v23 = vadd.f32 1e-05, %v2452_v19  ;;  %v2701_v19 = vld [vmem:[#allocation11 + $0x318] sm:$0xff] }
 0xbc9   : > { %2787 = vmatpush.msrb.mxu2 %v2701_v19 }
 0xbca   : > { %3286 = vrsqrt.f32 %v2453_v23  ;;  %vm2460_vm13 = vweird.f32 %v2453_v23 }
 0xbcb   : > { %2788 = vmatpush.msrb.mxu2 %v2700_v21 }
 0xbd0   : > { %v3287_v24 = vpop.eup %3286 }
 0xbd1   : > { %v2455_v27 = vmul.f32 %v3287_v24, %v2453_v23  ;;  %vm2461_vm12 = vweird.f32 %v3287_v24  ;;  %v2539_v23 = vld [vmem:[#allocation10 + $0x4] sm:$0xf] }
 0xbd2   : > { %vm2462_vm14 = vmor %vm2460_vm13, %vm2461_vm12  ;;  %v2543_v36 = vperm.slane %v2539_v23, 2  ;;  %v2544_v37 = vperm.slane %v2539_v23, 3 }
 0xbd3   : > { %v2456_v25 = vmul.f32 %v3287_v24, %v2455_v27  ;;  %v2715_v27 = vld [vmem:[#allocation11 + $0x388] sm:$0xff] }
 0xbd4   : > { %2809 = vmatpush.msrb.mxu3 %v2715_v27 }
 0xbd5   : > { %v2457_v26 = vmul.f32 0.5, %v2456_v25  ;;  %v2698_v25 = vld [vmem:[#allocation11 + $0x300] sm:$0xff] }
 0xbd7   : > { %v2458_v28 = vsub.f32 1.5, %v2457_v26  ;;  %v2714_v26 = vld [vmem:[#allocation11 + $0x380] sm:$0xff] }
 0xbd8   : > { %2810 = vmatpush.msrb.mxu3 %v2714_v26 }
 0xbd9   : > { %v2459_v29 = vmul.f32 %v3287_v24, %v2458_v28  ;;  %v2541_v28 = vperm.slane %v2539_v23, 0 }
 0xbdb   : > { %v2463_v31 = vsel %vm2462_vm14, %v3287_v24, %v2459_v29  ;;  %v2699_v24 = vld [vmem:[#allocation11 + $0x308] sm:$0xff]  ;;  %v2542_v29 = vperm.slane %v2539_v23, 1 }
 0xbdc   : > { %v2464_v6 = vmul.f32 %v2463_v31, %v4098_v15  ;;  %v2676_v15 = vld [vmem:[#allocation11 + $0x250] sm:$0xff]  ;;  %2789 = vmatpush.msrb.mxu2 %v2699_v24 }
 0xbdd   : > { %2740 = vmatpush.msrb.mxu0 %v2676_v15 }
 0xbde   : > { %v2468_v33 = vmul.f32 %v3233_v30, %v2464_v6  ;;  %2790 = vmatpush.msrb.mxu2 %v2698_v25 }
 0xbdf   : > { %2741 = vmatpush.msrb.mxu0 %v2675_v42 }
 0xbe0   : > { %v4107_v34 = vadd.f32 %v3234_v32, %v2468_v33 }
 0xbe1   : > { %2742 = vmatpush.msrb.mxu0 %v2674_v46 }
 0xbe2   : > { %2565 = vmatmul.f32.vlgmr.msra.gmra.mxu0 %v4107_v34  ;;  %2585 = vmatmul.f32.vlgmr.msra.gmra.mxu1 %v4107_v34 }
 0xbe3   : > { %2605 = vmatmul.f32.vlgmr.msra.gmra.mxu2 %v4107_v34  ;;  %2625 = vmatmul.f32.vlgmr.msra.gmra.mxu3 %v4107_v34 }
 0xbe4   : > { %2743 = vmatpush.msrb.mxu0 %v2673_v50 }
 0xbe6   : > { %2744 = vmatpush.msrb.mxu0 %v2672_v54 }
 0xbe8   : > { %2745 = vmatpush.msrb.mxu0 %v2671_v59 }
 0xbea   : > { %2746 = vmatpush.msrb.mxu0 %v2670_v63 }
 0xbec   : > { %2747 = vmatpush.msrb.mxu0 %v2669_v4 }
 0xbee   : > { %2748 = vmatpush.msrb.mxu0 %v2668_v9 }
 0xbf0   : > { %2749 = vmatpush.msrb.mxu0 %v2667_v13 }
 0xbf2   : > { %2750 = vmatpush.msrb.mxu0 %v2666_v17 }
 0xc5f   : > { %v2566_v30 = vpop.f32.mrf.mxu0  ;;  %v2586_v31 = vpop.f32.mrf.mxu1 }
 0xc60   : > { %v2567_v6 = vadd.f32 %v2566_v30, %v2541_v28  ;;  %v2587_v32 = vadd.f32 %v2586_v31, %v2542_v29 }
 0xc62   : > { %v2633_v33 = vmul.f32 0.044715, %v2567_v6  ;;  %v2634_v35 = vmul.f32 0.044715, %v2587_v32  ;;  %v2629_v62 = vmul.f32 0.5, %v2567_v6  ;;  %v2630_v0 = vmul.f32 0.5, %v2587_v32 }
 0xc64   : > { %v2637_v38 = vmul.f32 %v2633_v33, %v2567_v6  ;;  %v2638_v15 = vmul.f32 %v2634_v35, %v2587_v32 }
 0xc66   : > { %v2641_v39 = vmul.f32 %v2637_v38, %v2567_v6  ;;  %v2642_v40 = vmul.f32 %v2638_v15, %v2587_v32  ;;  %v2606_v41 = vpop.f32.mrf.mxu2  ;;  %v2626_v42 = vpop.f32.mrf.mxu3  ;;  %v3237_v38 = vld [vmem:[%s4202_s23 + $0x1] ss:$0 sm:$0xff] }
 0xc67   : > { %v2607_v43 = vadd.f32 %v2606_v41, %v2543_v36  ;;  %v2627_v44 = vadd.f32 %v2626_v42, %v2544_v37  ;;  %v3236_v36 = vld [vmem:[%s4201_s25 + $0x1] ss:$0 sm:$0xff] }
 0xc68   : > { %v2645_v45 = vadd.f32 %v2641_v39, %v2567_v6  ;;  %v2646_v46 = vadd.f32 %v2642_v40, %v2587_v32 }
 0xc69   : > { %v2635_v47 = vmul.f32 0.044715, %v2607_v43  ;;  %v2636_v48 = vmul.f32 0.044715, %v2627_v44  ;;  %v2631_v8 = vmul.f32 0.5, %v2607_v43  ;;  %v2632_v10 = vmul.f32 0.5, %v2627_v44 }
 0xc6a   : > { %v2649_v49 = vmul.f32 0.7978846, %v2645_v45  ;;  %v2650_v50 = vmul.f32 0.7978846, %v2646_v46 }
 0xc6b   : > { %v2639_v51 = vmul.f32 %v2635_v47, %v2607_v43  ;;  %v2640_v52 = vmul.f32 %v2636_v48, %v2627_v44 }
 0xc6c   : > { %3288 = vtanh.f32 %v2649_v49 }
 0xc6d   : > { %v2643_v53 = vmul.f32 %v2639_v51, %v2607_v43  ;;  %v2644_v54 = vmul.f32 %v2640_v52, %v2627_v44  ;;  %3290 = vtanh.f32 %v2650_v50 }
 0xc6f   : > { %v2647_v55 = vadd.f32 %v2643_v53, %v2607_v43  ;;  %v2648_v56 = vadd.f32 %v2644_v54, %v2627_v44 }
 0xc71   : > { %v2651_v57 = vmul.f32 0.7978846, %v2647_v55  ;;  %v2652_v59 = vmul.f32 0.7978846, %v2648_v56 }
 0xc72   : > { %v3289_v60 = vpop.eup %3288 }
 0xc73   : > { %v3291_v61 = vpop.eup %3290  ;;  %v2657_v63 = vadd.f32 1.0, %v3289_v60  ;;  %3292 = vtanh.f32 %v2651_v57 }
 0xc74   : > { %v2658_v1 = vadd.f32 1.0, %v3291_v61  ;;  %3294 = vtanh.f32 %v2652_v59 }
 0xc75   : > { %v2661_v3 = vmul.f32 %v2657_v63, %v2629_v62 }
 0xc76   : > { %v2662_v4 = vmul.f32 %v2658_v1, %v2630_v0 }
 0xc77   : > { %2751 = vmatmul.f32.vlgmr.msrb.gmra.mxu0 %v2661_v3 }
 0xc78   : > { %2771 = vmatmul.f32.vlgmr.msrb.gmra.mxu1 %v2662_v4 }
 0xc79   : > { %v3293_v5 = vpop.eup %3292 }
 0xc7a   : > { %v3295_v58 = vpop.eup %3294  ;;  %v2659_v9 = vadd.f32 1.0, %v3293_v5 }
 0xc7b   : > { %v2660_v11 = vadd.f32 1.0, %v3295_v58 }
 0xc7c   : > { %v2663_v12 = vmul.f32 %v2659_v9, %v2631_v8 }
 0xc7d   : > { %v2664_v13 = vmul.f32 %v2660_v11, %v2632_v10 }
 0xc7e   : > { %2791 = vmatmul.f32.vlgmr.msrb.gmra.mxu2 %v2663_v12 }
 0xc7f   : > { %2811 = vmatmul.f32.vlgmr.msrb.gmra.mxu3 %v2664_v13 }
 0xcf4   : > { %v2752_v2 = vpop.f32.mrf.mxu0 }
 0xcf5   : > { %v2753_v16 = vadd.f32 %v3235_v14, %v2752_v2  ;;  %v2772_v17 = vpop.f32.mrf.mxu1 }
 0xcf7   : > { %v2773_v18 = vadd.f32 %v2772_v17, %v2753_v16 }
 0xd01   : > { %v2792_v19 = vpop.f32.mrf.mxu2 }
 0xd02   : > { %v2793_v20 = vadd.f32 %v2792_v19, %v2773_v18  ;;  %v2812_v21 = vpop.f32.mrf.mxu3 }
 0xd04   : > { %v2813_v22 = vadd.f32 %v2812_v21, %v2793_v20 }
 0xd06   : > { %v2815_v23 = vadd.f32 %v2813_v22, %v4107_v34 }
 0xd08   : > { %2820 = vadd.xlane.f32.xlu0 %v2815_v23 }
 0xd7b   : > { %v2821_v24 = vpop.xlane.xlu0 %2820 }
 0xd7c   : > { %v2822_v27 = vmul.f32 %v2821_v24, %v3803_v7 }
 0xd7e   : > { %v2823_v25 = vsub.f32 %v2815_v23, %v2822_v27 }
 0xd80   : > { %v2824_v26 = vmul.f32 %v2823_v25, %v2823_v25 }
 0xd82   : > { %2825 = vadd.xlane.f32.xlu1 %v2824_v26 }
 0xdf5   : > { %v2826_v28 = vpop.xlane.xlu1 %2825 }
 0xdf6   : > { %v2827_v29 = vmul.f32 %v2826_v28, %v3803_v7 }
 0xdf8   : > { %v2828_v30 = vadd.f32 1e-05, %v2827_v29 }
 0xdfa   : > { %3296 = vrsqrt.f32 %v2828_v30  ;;  %vm2835_vm0 = vweird.f32 %v2828_v30 }
 0xe00   : > { %v3297_v31 = vpop.eup %3296 }
 0xe01   : > { %v2830_v6 = vmul.f32 %v3297_v31, %v2828_v30  ;;  %vm2836_vm15 = vweird.f32 %v3297_v31 }
 0xe02   : > { %vm2837_vm1 = vmor %vm2835_vm0, %vm2836_vm15 }
 0xe03   : > { %v2831_v32 = vmul.f32 %v3297_v31, %v2830_v6 }
 0xe05   : > { %v2832_v33 = vmul.f32 0.5, %v2831_v32 }
 0xe07   : > { %v2833_v35 = vsub.f32 1.5, %v2832_v33 }
 0xe09   : > { %v2834_v34 = vmul.f32 %v3297_v31, %v2833_v35 }
 0xe0b   : > { %v2838_v7 = vsel %vm2837_vm1, %v3297_v31, %v2834_v34 }
 0xe0c   : > { %v2839_v37 = vmul.f32 %v2838_v7, %v2823_v25 }
 0xe0e   : > { %v2843_v15 = vmul.f32 %v3236_v36, %v2839_v37 }
 0xe10   : > { %v2847_v39 = vadd.f32 %v3237_v38, %v2843_v15 }
 0xe12   : > { %2848 = vst [vmem:[%s599_s21] sm:$0xff] %v2847_v39 }
 0xe13   : > { %3535 = shalt.err (!%p3532_p8)
}
 0xe14   : > { %3109 = dma.vmem_to_hbm [thread:$0]  (%p3722_p5), %s2863_s22, 128, %s2865_s15, %s2850_s28  }
 0xe15 PF: > { %s4206_s29 = sld [smem:[#allocation23_spill]] }
 0xe16   : > { %s4207_s24 = sld [smem:[#allocation20_spill]] }
 0xe1b   : > { %p3151_p9 = scmp.ge.s32.totalorder %s4206_s29, 2 }
 0xe1c   : > { %s2876_s27 = sand.u32 1, %s4207_s24  }
 0xe1d   : > { %p3134_p10 = pnand %p3151_p9, %p3726_p6  ;;  %s2877_s30 = scalar_lea.sflag [#allocation4], %s2876_s27 }
 0xe1f   : > { %p3135_p11 = pneg %p3134_p10 }
 0xe21   : > { %3569 = dma.done.wait (%p3135_p11), %s2877_s30, 128  }
 0xe22   : > { %3571 = vsyncadd (%p3135_p11), %s2877_s30, 4294967168  ;;  %s4209_s21 = sld [smem:[#allocation24_spill]] }
 0xe23   : > { %s4210_s18 = sld [smem:[#allocation21_spill]] }
 0xe24   : > { %s4211_s19 = sld [smem:[#allocation22_spill]] }
 0xe25   : > { %s4212_s20 = sld [smem:[#allocation25_spill]] }
 0xe28   : > { %p29_p12 = scmp.ge.s32.totalorder %s4209_s21, 4  }
 0xe2a   :  { %31 = sbr.rel (!%p29_p12) target bundleno = 13 (0xd), region = 156 }
 0xe2f   :  { %2883 = vsyncpa [#allocation3], 1 }
 0xe30   :  { %2885 = vsyncpa [#allocation3 + $0x1], 1 }
 0xe31   :  { %2886 = vsyncpa [#allocation6], 1 }
 0xe32   :  { %2887 = vsyncpa [#allocation9], 1 }
 0xe33   :  { %2888 = vsyncpa [#allocation12], 1 }
 0xe34   :  { %2889 = vsyncpa [#allocation4], 1 }
 0xe35   :  { %2891 = vsyncpa [#allocation4 + $0x1], 1 }

</bundles_post_ra>
